<compile_context>
chip_gen: v7x
topology: tpu7x:2x2x1
jax: 0.10.0
libtpu: 0.0.40
codegen_flags: <defaults>
</compile_context>

<pallas_src>
import functools

import jax
import jax.numpy as jnp
from jax.experimental import pallas as pl
from jax.experimental.pallas import tpu as pltpu


# ---------------------------------------------------------------------------
# Fused kernel: LSTM over demonstration + MLP Q-head, single grid step.
# ---------------------------------------------------------------------------
def fused_q_kernel(demo_ref, state_ref,
                   wih_ref, whh_ref, blstm_ref,
                   w1s_ref, w1h_ref, b1_ref,
                   w2_ref, b2_ref, w3_ref, b3_ref,
                   out_ref, *, L, R, Hp):
    # ---- Hoisted LSTM input projection: ONE matmul for all L time steps. ----
    # demo rows are time-major (row = t*R + r); kept as a register value
    # (~L*R*4*Hp*4 bytes, compiler spills to VMEM only if needed).
    xp = (jnp.dot(demo_ref[...], wih_ref[...],
                  preferred_element_type=jnp.float32)
          + blstm_ref[...])                       # (L*R, 4*Hp), bias added once

    whh = whh_ref[...]                            # (Hp, 4*Hp) bf16, K=128-aligned

    h = jnp.zeros((R, Hp), jnp.float32)
    c = jnp.zeros((R, Hp), jnp.float32)

    # Fully static unroll (L is small); slices of xp are static and
    # sublane-aligned because R is a multiple of 8.
    for t in range(L):
        gates = xp[t * R:(t + 1) * R, :] + jnp.dot(
            h.astype(whh.dtype), whh, preferred_element_type=jnp.float32
        )                                          # (R, 4*Hp), gate order [i,f,o,g]
        sig = jax.nn.sigmoid(gates[:, :3 * Hp])    # one EUP launch for i,f,o
        g_g = jnp.tanh(gates[:, 3 * Hp:4 * Hp])    # one EUP launch for g
        i_g = sig[:, 0 * Hp:1 * Hp]
        f_g = sig[:, 1 * Hp:2 * Hp]
        o_g = sig[:, 2 * Hp:3 * Hp]
        c = f_g * c + i_g * g_g
        h = o_g * jnp.tanh(c)

    # ---- Fused MLP head. torch.cat((obs, enc)) realized as split-weight
    # matmuls; h row r already matches state row r (batch-tiled in wrapper),
    # so the combination is a plain elementwise add (no concat / broadcast). ----
    h1 = jnp.maximum(
        jnp.dot(state_ref[...], w1s_ref[...], preferred_element_type=jnp.float32)
        + jnp.dot(h.astype(w1h_ref.dtype), w1h_ref[...],
                  preferred_element_type=jnp.float32)
        + b1_ref[...], 0.0)                                               # (R, Mp)
    h2 = jnp.maximum(
        jnp.dot(h1.astype(w2_ref.dtype), w2_ref[...],
                preferred_element_type=jnp.float32) + b2_ref[...], 0.0)   # (R, Mp)
    out_ref[...] = (
        jnp.dot(h2.astype(w3_ref.dtype), w3_ref[...],
                preferred_element_type=jnp.float32) + b3_ref[...])        # (R, Ap)


def _full_spec(shape):
    # Whole-array block at the single grid point.
    return pl.BlockSpec(shape, lambda i, _n=len(shape): (0,) * _n)


def _fused_forward_call(demo_flat, state_flat, p, *, L, R):
    Hp = p["w_hh"].shape[0]           # padded per-gate hidden width (128)
    Ap = p["w3"].shape[1]             # padded action width (128)

    kernel = functools.partial(fused_q_kernel, L=L, R=R, Hp=Hp)

    return pl.pallas_call(
        kernel,
        out_shape=jax.ShapeDtypeStruct((R, Ap), jnp.float32),
        grid_spec=pltpu.PrefetchScalarGridSpec(
            num_scalar_prefetch=0,
            grid=(1,),
            in_specs=[
                _full_spec(demo_flat.shape),
                _full_spec(state_flat.shape),
                _full_spec(p["w_ih"].shape),
                _full_spec(p["w_hh"].shape),
                _full_spec(p["b_lstm"].shape),
                _full_spec(p["w1_s"].shape),
                _full_spec(p["w1_h"].shape),
                _full_spec(p["b1"].shape),
                _full_spec(p["w2"].shape),
                _full_spec(p["b2"].shape),
                _full_spec(p["w3"].shape),
                _full_spec(p["b3"].shape),
            ],
            out_specs=_full_spec((R, Ap)),
        ),
        compiler_params=pltpu.CompilerParams(
            dimension_semantics=("arbitrary",)),
    )(demo_flat, state_flat,
      p["w_ih"], p["w_hh"], p["b_lstm"],
      p["w1_s"], p["w1_h"], p["b1"],
      p["w2"], p["b2"], p["w3"], p["b3"])


# ---------------------------------------------------------------------------
# Forward pass wrapper (semantics of the PyTorch module).
# ---------------------------------------------------------------------------
def _round_up(x, m):
    return ((x + m - 1) // m) * m


def demonstration_recurrent_q_forward(state, demonstration, params, *, action_dim):
    """
    state:         (T, B, I)          -- observation.state
    demonstration: (T, B, L, I)       -- observation.demonstration
    returns:       (T, B, action_dim) -- Q-values
    """
    T, B, I = state.shape
    L = demonstration.shape[2]
    R = max(8, _round_up(T * B, 8))   # sublane-padded row count for everything

    # demonstration.view(T,B,L,-1)[0].permute(1,0,2) -> time-major (L, B, I),
    # then batch-tile to R virtual rows so LSTM row r carries real batch
    # (r % B); h row r then lines up with flattened state row r = t*B + b.
    # (For large T this recomputes the LSTM per T — re-split if T*B scales up.)
    demo_b = jnp.transpose(demonstration[0], (1, 0, 2))          # (L, B, I)
    demo_exp = jnp.take(demo_b, jnp.arange(R) % B, axis=1)       # (L, R, I)
    demo_flat = demo_exp.reshape(L * R, I)

    state_flat = state.reshape(T * B, I)
    state_flat = jnp.pad(state_flat, ((0, R - T * B), (0, 0)))   # (R, I)

    out_pad = _fused_forward_call(demo_flat, state_flat, params, L=L, R=R)
    # Lane-dense kernel output (R, 128); slice back to (T*B, action_dim).
    return out_pad[:T * B, :action_dim].reshape(T, B, action_dim)


# ---------------------------------------------------------------------------
# Parameters: PyTorch-layout synthetic weights + conversion to the padded,
# transposed, gate-reordered, (partially) bf16 kernel layout. Zero padding
# keeps the math exact.
# ---------------------------------------------------------------------------
def make_pytorch_style_params(input_size, action_dim, key):
    H = 4 * input_size  # lstm_size
    ks = jax.random.split(key, 10)
    s = 0.1
    n = lambda k, shape: s * jax.random.normal(k, shape, jnp.float32)
    return dict(
        w_ih=n(ks[0], (4 * H, input_size)),   # nn.LSTM weight_ih_l0, gates [i,f,g,o]
        w_hh=n(ks[1], (4 * H, H)),            # nn.LSTM weight_hh_l0
        b_ih=n(ks[2], (4 * H,)),
        b_hh=n(ks[3], (4 * H,)),
        w1=n(ks[4], (64, input_size + H)),    # combination_layer
        b1=n(ks[5], (64,)),
        w2=n(ks[6], (64, 64)),                # middle_layer
        b2=n(ks[7], (64,)),
        w3=n(ks[8], (action_dim, 64)),        # output_layer
        b3=n(ks[9], (action_dim,)),
    )


def convert_params(pt):
    I = pt["w_ih"].shape[1]
    H = pt["w_hh"].shape[1]
    Mh = pt["w2"].shape[0]
    A = pt["w3"].shape[0]
    Hp = max(128, _round_up(H, 128))     # per-gate padded hidden width
    Mp = max(128, _round_up(Mh, 128))    # padded MLP hidden width
    Ap = max(128, _round_up(A, 128))     # padded action width

    # PyTorch gate order [i, f, g, o] -> kernel order [i, f, o, g] so the three
    # sigmoid gates are contiguous lanes (one grouped sigmoid per step).
    GATE_ORDER = (0, 1, 3, 2)

    def pad_gate_cols(w):  # (rows, 4H) -> (rows, 4*Hp), reorder + zero-pad per gate
        gates = [jnp.pad(w[:, g * H:(g + 1) * H], ((0, 0), (0, Hp - H)))
                 for g in GATE_ORDER]
        return jnp.concatenate(gates, axis=1)

    w_ih_t = pt["w_ih"].T                           # (I, 4H)
    w_hh_t = pt["w_hh"].T                           # (H, 4H)
    b_lstm = (pt["b_ih"] + pt["b_hh"])[None, :]     # combined bias, (1, 4H)
    w1_t = pt["w1"].T                               # (I+H, 64)

    return dict(
        # LSTM (K=I contraction stays f32; K=Hp contraction stored bf16)
        w_ih=pad_gate_cols(w_ih_t),                                                # (I, 4Hp) f32
        w_hh=jnp.pad(pad_gate_cols(w_hh_t),
                     ((0, Hp - H), (0, 0))).astype(jnp.bfloat16),                  # (Hp, 4Hp) bf16
        b_lstm=pad_gate_cols(b_lstm),                                              # (1, 4Hp) f32
        # MLP head (split combination weight: state-part / encoding-part).
        # h itself is NOT gate-reordered, so w1_h keeps its natural row order.
        w1_s=jnp.pad(w1_t[:I], ((0, 0), (0, Mp - Mh))),                            # (I, Mp) f32
        w1_h=jnp.pad(w1_t[I:], ((0, Hp - H), (0, Mp - Mh))).astype(jnp.bfloat16),  # (Hp, Mp) bf16
        b1=jnp.pad(pt["b1"][None, :], ((0, 0), (0, Mp - Mh))),
        w2=jnp.pad(pt["w2"].T, ((0, Mp - Mh), (0, Mp - Mh))).astype(jnp.bfloat16), # (Mp, Mp) bf16
        b2=jnp.pad(pt["b2"][None, :], ((0, 0), (0, Mp - Mh))),
        w3=jnp.pad(pt["w3"].T, ((0, Mp - Mh), (0, Ap - A))).astype(jnp.bfloat16),  # (Mp, Ap) bf16
        b3=jnp.pad(pt["b3"][None, :], ((0, 0), (0, Ap - A))),
    )


# ---------------------------------------------------------------------------
# Pure-JAX reference (mirrors the PyTorch module, unpadded f32) for validation.
# ---------------------------------------------------------------------------
def reference_forward(state, demonstration, pt):
    T, B, I = state.shape
    H = pt["w_hh"].shape[1]
    demo = jnp.transpose(demonstration[0], (1, 0, 2))   # (L, B, I)
    h = jnp.zeros((B, H), jnp.float32)
    c = jnp.zeros((B, H), jnp.float32)
    for t in range(demo.shape[0]):
        g = demo[t] @ pt["w_ih"].T + pt["b_ih"] + h @ pt["w_hh"].T + pt["b_hh"]
        i_g = jax.nn.sigmoid(g[:, 0 * H:1 * H])
        f_g = jax.nn.sigmoid(g[:, 1 * H:2 * H])
        g_g = jnp.tanh(g[:, 2 * H:3 * H])
        o_g = jax.nn.sigmoid(g[:, 3 * H:4 * H])
        c = f_g * c + i_g * g_g
        h = o_g * jnp.tanh(c)
    enc = jnp.broadcast_to(h[None], (T, B, H))
    x = jnp.concatenate([state, enc], axis=-1)
    x = jax.nn.relu(x @ pt["w1"].T + pt["b1"])
    x = jax.nn.relu(x @ pt["w2"].T + pt["b2"])
    return x @ pt["w3"].T + pt["b3"]                    # (T, B, A)


if __name__ == "__main__":
    # Small shapes consistent with the module.
    T, B = 2, 2
    input_size = 8                  # env_spaces.observation.shape.state[0]
    action_dim = 4                  # env_spaces.action.n
    demonstration_length = 6        # env_spaces.observation.shape.demonstration[0]

    key = jax.random.PRNGKey(0)
    k_state, k_demo, k_params = jax.random.split(key, 3)

    state = jax.random.normal(k_state, (T, B, input_size), jnp.float32)
    demonstration = jax.random.normal(
        k_demo, (T, B, demonstration_length, input_size), jnp.float32)

    pt_params = make_pytorch_style_params(input_size, action_dim, k_params)
    kernel_params = convert_params(pt_params)

    # NOTE: prev_action / prev_reward are accepted by the PyTorch forward but
    # never used; they are omitted here.
    fwd = jax.jit(functools.partial(
        demonstration_recurrent_q_forward, action_dim=action_dim))

    q = fwd(state, demonstration, kernel_params)
    jax.block_until_ready(q)
    assert q.shape == (T, B, action_dim)

    q_ref = reference_forward(state, demonstration, pt_params)
    err = float(jnp.max(jnp.abs(q - q_ref)))
    assert err < 1e-2, f"max abs error vs reference: {err}"

    print("KERNEL_OK")
</pallas_src>

<mosaic_0001>
module attributes {stable_mosaic.version = 11 : i64} {
  func.func @fused_q_kernel(%arg0: i32, %arg1: memref<48x8xf32, #tpu.memory_space<vmem>>, %arg2: memref<8x8xf32, #tpu.memory_space<vmem>>, %arg3: memref<8x512xf32, #tpu.memory_space<vmem>>, %arg4: memref<128x512xbf16, #tpu.memory_space<vmem>>, %arg5: memref<1x512xf32, #tpu.memory_space<vmem>>, %arg6: memref<8x128xf32, #tpu.memory_space<vmem>>, %arg7: memref<128x128xbf16, #tpu.memory_space<vmem>>, %arg8: memref<1x128xf32, #tpu.memory_space<vmem>>, %arg9: memref<128x128xbf16, #tpu.memory_space<vmem>>, %arg10: memref<1x128xf32, #tpu.memory_space<vmem>>, %arg11: memref<128x128xbf16, #tpu.memory_space<vmem>>, %arg12: memref<1x128xf32, #tpu.memory_space<vmem>>, %arg13: memref<8x128xf32, #tpu.memory_space<vmem>>) attributes {dimension_semantics = [#tpu.dimension_semantics<arbitrary>], iteration_bounds = array<i64: 1>, scalar_prefetch = 0 : i64, scratch_operands = 0 : i64, tpu.core_type = #tpu.core_type<tc>, window_params = [{pipeline_mode = #tpu.pipeline_mode<synchronous>, transform_indices = @transform_0, window_bounds = array<i64: 48, 8>}, {pipeline_mode = #tpu.pipeline_mode<synchronous>, transform_indices = @transform_1, window_bounds = array<i64: 8, 8>}, {pipeline_mode = #tpu.pipeline_mode<synchronous>, transform_indices = @transform_2, window_bounds = array<i64: 8, 512>}, {pipeline_mode = #tpu.pipeline_mode<synchronous>, transform_indices = @transform_3, window_bounds = array<i64: 128, 512>}, {pipeline_mode = #tpu.pipeline_mode<synchronous>, transform_indices = @transform_4, window_bounds = array<i64: 1, 512>}, {pipeline_mode = #tpu.pipeline_mode<synchronous>, transform_indices = @transform_5, window_bounds = array<i64: 8, 128>}, {pipeline_mode = #tpu.pipeline_mode<synchronous>, transform_indices = @transform_6, window_bounds = array<i64: 128, 128>}, {pipeline_mode = #tpu.pipeline_mode<synchronous>, transform_indices = @transform_7, window_bounds = array<i64: 1, 128>}, {pipeline_mode = #tpu.pipeline_mode<synchronous>, transform_indices = @transform_8, window_bounds = array<i64: 128, 128>}, {pipeline_mode = #tpu.pipeline_mode<synchronous>, transform_indices = @transform_9, window_bounds = array<i64: 1, 128>}, {pipeline_mode = #tpu.pipeline_mode<synchronous>, transform_indices = @transform_10, window_bounds = array<i64: 128, 128>}, {pipeline_mode = #tpu.pipeline_mode<synchronous>, transform_indices = @transform_11, window_bounds = array<i64: 1, 128>}, {pipeline_mode = #tpu.pipeline_mode<synchronous>, transform_indices = @transform_12, window_bounds = array<i64: 8, 128>}]} {
    %c0 = arith.constant 0 : index
    %c0_0 = arith.constant 0 : index
    %0 = vector.load %arg1[%c0, %c0_0] : memref<48x8xf32, #tpu.memory_space<vmem>>, vector<48x8xf32>
    %c0_1 = arith.constant 0 : index
    %c0_2 = arith.constant 0 : index
    %1 = vector.load %arg3[%c0_1, %c0_2] : memref<8x512xf32, #tpu.memory_space<vmem>>, vector<8x512xf32>
    %cst = arith.constant dense<0.000000e+00> : vector<48x512xf32>
    %2 = tpu.matmul %0, %1, %cst {dimension_numbers = #tpu.dot_dimension_numbers<[1], [0], [0], [1], [0, 0, 1, 1], [], []>} : vector<48x8xf32>, vector<8x512xf32>, vector<48x512xf32> -> vector<48x512xf32>
    %c0_3 = arith.constant 0 : index
    %c0_4 = arith.constant 0 : index
    %3 = vector.load %arg5[%c0_3, %c0_4] : memref<1x512xf32, #tpu.memory_space<vmem>>, vector<1x512xf32>
    %4 = vector.broadcast %3 : vector<1x512xf32> to vector<48x512xf32>
    %5 = arith.addf %2, %4 : vector<48x512xf32>
    %c0_5 = arith.constant 0 : index
    %c0_6 = arith.constant 0 : index
    %6 = vector.load %arg4[%c0_5, %c0_6] : memref<128x512xbf16, #tpu.memory_space<vmem>>, vector<128x512xbf16>
    %cst_7 = arith.constant 0.000000e+00 : f32
    %7 = vector.broadcast %cst_7 : f32 to vector<8x128xf32>
    %cst_8 = arith.constant 0.000000e+00 : f32
    %8 = vector.broadcast %cst_8 : f32 to vector<8x128xf32>
    %9 = vector.extract_strided_slice %5 {offsets = [0, 0], sizes = [8, 512], strides = [1, 1]} : vector<48x512xf32> to vector<8x512xf32>
    %10 = arith.truncf %7 : vector<8x128xf32> to vector<8x128xbf16>
    %cst_9 = arith.constant dense<0.000000e+00> : vector<8x512xf32>
    %11 = tpu.matmul %10, %6, %cst_9 {dimension_numbers = #tpu.dot_dimension_numbers<[1], [0], [0], [1], [0, 0, 1, 1], [], []>} : vector<8x128xbf16>, vector<128x512xbf16>, vector<8x512xf32> -> vector<8x512xf32>
    %12 = arith.addf %9, %11 : vector<8x512xf32>
    %13 = vector.extract_strided_slice %12 {offsets = [0, 0], sizes = [8, 384], strides = [1, 1]} : vector<8x512xf32> to vector<8x384xf32>
    %14 = arith.negf %13 : vector<8x384xf32>
    %15 = math.exp %14 : vector<8x384xf32>
    %cst_10 = arith.constant 1.000000e+00 : f32
    %16 = vector.broadcast %cst_10 : f32 to vector<8x384xf32>
    %17 = arith.addf %16, %15 : vector<8x384xf32>
    %18 = arith.divf %16, %17 : vector<8x384xf32>
    %19 = vector.extract_strided_slice %12 {offsets = [0, 384], sizes = [8, 128], strides = [1, 1]} : vector<8x512xf32> to vector<8x128xf32>
    %20 = math.tanh %19 : vector<8x128xf32>
    %21 = vector.extract_strided_slice %18 {offsets = [0, 0], sizes = [8, 128], strides = [1, 1]} : vector<8x384xf32> to vector<8x128xf32>
    %22 = vector.extract_strided_slice %18 {offsets = [0, 128], sizes = [8, 128], strides = [1, 1]} : vector<8x384xf32> to vector<8x128xf32>
    %23 = vector.extract_strided_slice %18 {offsets = [0, 256], sizes = [8, 128], strides = [1, 1]} : vector<8x384xf32> to vector<8x128xf32>
    %24 = arith.mulf %22, %8 : vector<8x128xf32>
    %25 = arith.mulf %21, %20 : vector<8x128xf32>
    %26 = arith.addf %24, %25 : vector<8x128xf32>
    %27 = math.tanh %26 : vector<8x128xf32>
    %28 = arith.mulf %23, %27 : vector<8x128xf32>
    %29 = vector.extract_strided_slice %5 {offsets = [8, 0], sizes = [8, 512], strides = [1, 1]} : vector<48x512xf32> to vector<8x512xf32>
    %30 = arith.truncf %28 : vector<8x128xf32> to vector<8x128xbf16>
    %cst_11 = arith.constant dense<0.000000e+00> : vector<8x512xf32>
    %31 = tpu.matmul %30, %6, %cst_11 {dimension_numbers = #tpu.dot_dimension_numbers<[1], [0], [0], [1], [0, 0, 1, 1], [], []>} : vector<8x128xbf16>, vector<128x512xbf16>, vector<8x512xf32> -> vector<8x512xf32>
    %32 = arith.addf %29, %31 : vector<8x512xf32>
    %33 = vector.extract_strided_slice %32 {offsets = [0, 0], sizes = [8, 384], strides = [1, 1]} : vector<8x512xf32> to vector<8x384xf32>
    %34 = arith.negf %33 : vector<8x384xf32>
    %35 = math.exp %34 : vector<8x384xf32>
    %cst_12 = arith.constant 1.000000e+00 : f32
    %36 = vector.broadcast %cst_12 : f32 to vector<8x384xf32>
    %37 = arith.addf %36, %35 : vector<8x384xf32>
    %38 = arith.divf %36, %37 : vector<8x384xf32>
    %39 = vector.extract_strided_slice %32 {offsets = [0, 384], sizes = [8, 128], strides = [1, 1]} : vector<8x512xf32> to vector<8x128xf32>
    %40 = math.tanh %39 : vector<8x128xf32>
    %41 = vector.extract_strided_slice %38 {offsets = [0, 0], sizes = [8, 128], strides = [1, 1]} : vector<8x384xf32> to vector<8x128xf32>
    %42 = vector.extract_strided_slice %38 {offsets = [0, 128], sizes = [8, 128], strides = [1, 1]} : vector<8x384xf32> to vector<8x128xf32>
    %43 = vector.extract_strided_slice %38 {offsets = [0, 256], sizes = [8, 128], strides = [1, 1]} : vector<8x384xf32> to vector<8x128xf32>
    %44 = arith.mulf %42, %26 : vector<8x128xf32>
    %45 = arith.mulf %41, %40 : vector<8x128xf32>
    %46 = arith.addf %44, %45 : vector<8x128xf32>
    %47 = math.tanh %46 : vector<8x128xf32>
    %48 = arith.mulf %43, %47 : vector<8x128xf32>
    %49 = vector.extract_strided_slice %5 {offsets = [16, 0], sizes = [8, 512], strides = [1, 1]} : vector<48x512xf32> to vector<8x512xf32>
    %50 = arith.truncf %48 : vector<8x128xf32> to vector<8x128xbf16>
    %cst_13 = arith.constant dense<0.000000e+00> : vector<8x512xf32>
    %51 = tpu.matmul %50, %6, %cst_13 {dimension_numbers = #tpu.dot_dimension_numbers<[1], [0], [0], [1], [0, 0, 1, 1], [], []>} : vector<8x128xbf16>, vector<128x512xbf16>, vector<8x512xf32> -> vector<8x512xf32>
    %52 = arith.addf %49, %51 : vector<8x512xf32>
    %53 = vector.extract_strided_slice %52 {offsets = [0, 0], sizes = [8, 384], strides = [1, 1]} : vector<8x512xf32> to vector<8x384xf32>
    %54 = arith.negf %53 : vector<8x384xf32>
    %55 = math.exp %54 : vector<8x384xf32>
    %cst_14 = arith.constant 1.000000e+00 : f32
    %56 = vector.broadcast %cst_14 : f32 to vector<8x384xf32>
    %57 = arith.addf %56, %55 : vector<8x384xf32>
    %58 = arith.divf %56, %57 : vector<8x384xf32>
    %59 = vector.extract_strided_slice %52 {offsets = [0, 384], sizes = [8, 128], strides = [1, 1]} : vector<8x512xf32> to vector<8x128xf32>
    %60 = math.tanh %59 : vector<8x128xf32>
    %61 = vector.extract_strided_slice %58 {offsets = [0, 0], sizes = [8, 128], strides = [1, 1]} : vector<8x384xf32> to vector<8x128xf32>
    %62 = vector.extract_strided_slice %58 {offsets = [0, 128], sizes = [8, 128], strides = [1, 1]} : vector<8x384xf32> to vector<8x128xf32>
    %63 = vector.extract_strided_slice %58 {offsets = [0, 256], sizes = [8, 128], strides = [1, 1]} : vector<8x384xf32> to vector<8x128xf32>
    %64 = arith.mulf %62, %46 : vector<8x128xf32>
    %65 = arith.mulf %61, %60 : vector<8x128xf32>
    %66 = arith.addf %64, %65 : vector<8x128xf32>
    %67 = math.tanh %66 : vector<8x128xf32>
    %68 = arith.mulf %63, %67 : vector<8x128xf32>
    %69 = vector.extract_strided_slice %5 {offsets = [24, 0], sizes = [8, 512], strides = [1, 1]} : vector<48x512xf32> to vector<8x512xf32>
    %70 = arith.truncf %68 : vector<8x128xf32> to vector<8x128xbf16>
    %cst_15 = arith.constant dense<0.000000e+00> : vector<8x512xf32>
    %71 = tpu.matmul %70, %6, %cst_15 {dimension_numbers = #tpu.dot_dimension_numbers<[1], [0], [0], [1], [0, 0, 1, 1], [], []>} : vector<8x128xbf16>, vector<128x512xbf16>, vector<8x512xf32> -> vector<8x512xf32>
    %72 = arith.addf %69, %71 : vector<8x512xf32>
    %73 = vector.extract_strided_slice %72 {offsets = [0, 0], sizes = [8, 384], strides = [1, 1]} : vector<8x512xf32> to vector<8x384xf32>
    %74 = arith.negf %73 : vector<8x384xf32>
    %75 = math.exp %74 : vector<8x384xf32>
    %cst_16 = arith.constant 1.000000e+00 : f32
    %76 = vector.broadcast %cst_16 : f32 to vector<8x384xf32>
    %77 = arith.addf %76, %75 : vector<8x384xf32>
    %78 = arith.divf %76, %77 : vector<8x384xf32>
    %79 = vector.extract_strided_slice %72 {offsets = [0, 384], sizes = [8, 128], strides = [1, 1]} : vector<8x512xf32> to vector<8x128xf32>
    %80 = math.tanh %79 : vector<8x128xf32>
    %81 = vector.extract_strided_slice %78 {offsets = [0, 0], sizes = [8, 128], strides = [1, 1]} : vector<8x384xf32> to vector<8x128xf32>
    %82 = vector.extract_strided_slice %78 {offsets = [0, 128], sizes = [8, 128], strides = [1, 1]} : vector<8x384xf32> to vector<8x128xf32>
    %83 = vector.extract_strided_slice %78 {offsets = [0, 256], sizes = [8, 128], strides = [1, 1]} : vector<8x384xf32> to vector<8x128xf32>
    %84 = arith.mulf %82, %66 : vector<8x128xf32>
    %85 = arith.mulf %81, %80 : vector<8x128xf32>
    %86 = arith.addf %84, %85 : vector<8x128xf32>
    %87 = math.tanh %86 : vector<8x128xf32>
    %88 = arith.mulf %83, %87 : vector<8x128xf32>
    %89 = vector.extract_strided_slice %5 {offsets = [32, 0], sizes = [8, 512], strides = [1, 1]} : vector<48x512xf32> to vector<8x512xf32>
    %90 = arith.truncf %88 : vector<8x128xf32> to vector<8x128xbf16>
    %cst_17 = arith.constant dense<0.000000e+00> : vector<8x512xf32>
    %91 = tpu.matmul %90, %6, %cst_17 {dimension_numbers = #tpu.dot_dimension_numbers<[1], [0], [0], [1], [0, 0, 1, 1], [], []>} : vector<8x128xbf16>, vector<128x512xbf16>, vector<8x512xf32> -> vector<8x512xf32>
    %92 = arith.addf %89, %91 : vector<8x512xf32>
    %93 = vector.extract_strided_slice %92 {offsets = [0, 0], sizes = [8, 384], strides = [1, 1]} : vector<8x512xf32> to vector<8x384xf32>
    %94 = arith.negf %93 : vector<8x384xf32>
    %95 = math.exp %94 : vector<8x384xf32>
    %cst_18 = arith.constant 1.000000e+00 : f32
    %96 = vector.broadcast %cst_18 : f32 to vector<8x384xf32>
    %97 = arith.addf %96, %95 : vector<8x384xf32>
    %98 = arith.divf %96, %97 : vector<8x384xf32>
    %99 = vector.extract_strided_slice %92 {offsets = [0, 384], sizes = [8, 128], strides = [1, 1]} : vector<8x512xf32> to vector<8x128xf32>
    %100 = math.tanh %99 : vector<8x128xf32>
    %101 = vector.extract_strided_slice %98 {offsets = [0, 0], sizes = [8, 128], strides = [1, 1]} : vector<8x384xf32> to vector<8x128xf32>
    %102 = vector.extract_strided_slice %98 {offsets = [0, 128], sizes = [8, 128], strides = [1, 1]} : vector<8x384xf32> to vector<8x128xf32>
    %103 = vector.extract_strided_slice %98 {offsets = [0, 256], sizes = [8, 128], strides = [1, 1]} : vector<8x384xf32> to vector<8x128xf32>
    %104 = arith.mulf %102, %86 : vector<8x128xf32>
    %105 = arith.mulf %101, %100 : vector<8x128xf32>
    %106 = arith.addf %104, %105 : vector<8x128xf32>
    %107 = math.tanh %106 : vector<8x128xf32>
    %108 = arith.mulf %103, %107 : vector<8x128xf32>
    %109 = vector.extract_strided_slice %5 {offsets = [40, 0], sizes = [8, 512], strides = [1, 1]} : vector<48x512xf32> to vector<8x512xf32>
    %110 = arith.truncf %108 : vector<8x128xf32> to vector<8x128xbf16>
    %cst_19 = arith.constant dense<0.000000e+00> : vector<8x512xf32>
    %111 = tpu.matmul %110, %6, %cst_19 {dimension_numbers = #tpu.dot_dimension_numbers<[1], [0], [0], [1], [0, 0, 1, 1], [], []>} : vector<8x128xbf16>, vector<128x512xbf16>, vector<8x512xf32> -> vector<8x512xf32>
    %112 = arith.addf %109, %111 : vector<8x512xf32>
    %113 = vector.extract_strided_slice %112 {offsets = [0, 0], sizes = [8, 384], strides = [1, 1]} : vector<8x512xf32> to vector<8x384xf32>
    %114 = arith.negf %113 : vector<8x384xf32>
    %115 = math.exp %114 : vector<8x384xf32>
    %cst_20 = arith.constant 1.000000e+00 : f32
    %116 = vector.broadcast %cst_20 : f32 to vector<8x384xf32>
    %117 = arith.addf %116, %115 : vector<8x384xf32>
    %118 = arith.divf %116, %117 : vector<8x384xf32>
    %119 = vector.extract_strided_slice %112 {offsets = [0, 384], sizes = [8, 128], strides = [1, 1]} : vector<8x512xf32> to vector<8x128xf32>
    %120 = math.tanh %119 : vector<8x128xf32>
    %121 = vector.extract_strided_slice %118 {offsets = [0, 0], sizes = [8, 128], strides = [1, 1]} : vector<8x384xf32> to vector<8x128xf32>
    %122 = vector.extract_strided_slice %118 {offsets = [0, 128], sizes = [8, 128], strides = [1, 1]} : vector<8x384xf32> to vector<8x128xf32>
    %123 = vector.extract_strided_slice %118 {offsets = [0, 256], sizes = [8, 128], strides = [1, 1]} : vector<8x384xf32> to vector<8x128xf32>
    %124 = arith.mulf %122, %106 : vector<8x128xf32>
    %125 = arith.mulf %121, %120 : vector<8x128xf32>
    %126 = arith.addf %124, %125 : vector<8x128xf32>
    %127 = math.tanh %126 : vector<8x128xf32>
    %128 = arith.mulf %123, %127 : vector<8x128xf32>
    %c0_21 = arith.constant 0 : index
    %c0_22 = arith.constant 0 : index
    %129 = vector.load %arg2[%c0_21, %c0_22] : memref<8x8xf32, #tpu.memory_space<vmem>>, vector<8x8xf32>
    %c0_23 = arith.constant 0 : index
    %c0_24 = arith.constant 0 : index
    %130 = vector.load %arg6[%c0_23, %c0_24] : memref<8x128xf32, #tpu.memory_space<vmem>>, vector<8x128xf32>
    %cst_25 = arith.constant dense<0.000000e+00> : vector<8x128xf32>
    %131 = tpu.matmul %129, %130, %cst_25 {dimension_numbers = #tpu.dot_dimension_numbers<[1], [0], [0], [1], [0, 0, 1, 1], [], []>} : vector<8x8xf32>, vector<8x128xf32>, vector<8x128xf32> -> vector<8x128xf32>
    %132 = arith.truncf %128 : vector<8x128xf32> to vector<8x128xbf16>
    %c0_26 = arith.constant 0 : index
    %c0_27 = arith.constant 0 : index
    %133 = vector.load %arg7[%c0_26, %c0_27] : memref<128x128xbf16, #tpu.memory_space<vmem>>, vector<128x128xbf16>
    %cst_28 = arith.constant dense<0.000000e+00> : vector<8x128xf32>
    %134 = tpu.matmul %132, %133, %cst_28 {dimension_numbers = #tpu.dot_dimension_numbers<[1], [0], [0], [1], [0, 0, 1, 1], [], []>} : vector<8x128xbf16>, vector<128x128xbf16>, vector<8x128xf32> -> vector<8x128xf32>
    %135 = arith.addf %131, %134 : vector<8x128xf32>
    %c0_29 = arith.constant 0 : index
    %c0_30 = arith.constant 0 : index
    %136 = vector.load %arg8[%c0_29, %c0_30] : memref<1x128xf32, #tpu.memory_space<vmem>>, vector<1x128xf32>
    %137 = vector.broadcast %136 : vector<1x128xf32> to vector<8x128xf32>
    %138 = arith.addf %135, %137 : vector<8x128xf32>
    %cst_31 = arith.constant 0.000000e+00 : f32
    %139 = vector.broadcast %cst_31 : f32 to vector<8x128xf32>
    %140 = arith.maximumf %138, %139 : vector<8x128xf32>
    %141 = arith.truncf %140 : vector<8x128xf32> to vector<8x128xbf16>
    %c0_32 = arith.constant 0 : index
    %c0_33 = arith.constant 0 : index
    %142 = vector.load %arg9[%c0_32, %c0_33] : memref<128x128xbf16, #tpu.memory_space<vmem>>, vector<128x128xbf16>
    %cst_34 = arith.constant dense<0.000000e+00> : vector<8x128xf32>
    %143 = tpu.matmul %141, %142, %cst_34 {dimension_numbers = #tpu.dot_dimension_numbers<[1], [0], [0], [1], [0, 0, 1, 1], [], []>} : vector<8x128xbf16>, vector<128x128xbf16>, vector<8x128xf32> -> vector<8x128xf32>
    %c0_35 = arith.constant 0 : index
    %c0_36 = arith.constant 0 : index
    %144 = vector.load %arg10[%c0_35, %c0_36] : memref<1x128xf32, #tpu.memory_space<vmem>>, vector<1x128xf32>
    %145 = vector.broadcast %144 : vector<1x128xf32> to vector<8x128xf32>
    %146 = arith.addf %143, %145 : vector<8x128xf32>
    %cst_37 = arith.constant 0.000000e+00 : f32
    %147 = vector.broadcast %cst_37 : f32 to vector<8x128xf32>
    %148 = arith.maximumf %146, %147 : vector<8x128xf32>
    %149 = arith.truncf %148 : vector<8x128xf32> to vector<8x128xbf16>
    %c0_38 = arith.constant 0 : index
    %c0_39 = arith.constant 0 : index
    %150 = vector.load %arg11[%c0_38, %c0_39] : memref<128x128xbf16, #tpu.memory_space<vmem>>, vector<128x128xbf16>
    %cst_40 = arith.constant dense<0.000000e+00> : vector<8x128xf32>
    %151 = tpu.matmul %149, %150, %cst_40 {dimension_numbers = #tpu.dot_dimension_numbers<[1], [0], [0], [1], [0, 0, 1, 1], [], []>} : vector<8x128xbf16>, vector<128x128xbf16>, vector<8x128xf32> -> vector<8x128xf32>
    %c0_41 = arith.constant 0 : index
    %c0_42 = arith.constant 0 : index
    %152 = vector.load %arg12[%c0_41, %c0_42] : memref<1x128xf32, #tpu.memory_space<vmem>>, vector<1x128xf32>
    %153 = vector.broadcast %152 : vector<1x128xf32> to vector<8x128xf32>
    %154 = arith.addf %151, %153 : vector<8x128xf32>
    %c0_43 = arith.constant 0 : index
    %c0_44 = arith.constant 0 : index
    %155 = vector.load %arg13[%c0_43, %c0_44] : memref<8x128xf32, #tpu.memory_space<vmem>>, vector<8x128xf32>
    tpu.vector_store %arg13[%c0_43, %c0_44], %154 {strides = array<i32>} : memref<8x128xf32, #tpu.memory_space<vmem>>, vector<8x128xf32>,
    return
  }
  func.func @transform_0(%arg0: i32) -> (i32, i32) {
    %c0_i32 = arith.constant 0 : i32
    %c0_i32_0 = arith.constant 0 : i32
    %c0_i32_1 = arith.constant 0 : i32
    return %c0_i32, %c0_i32_0 : i32, i32
  }
  func.func @transform_1(%arg0: i32) -> (i32, i32) {
    %c0_i32 = arith.constant 0 : i32
    %c0_i32_0 = arith.constant 0 : i32
    %c0_i32_1 = arith.constant 0 : i32
    return %c0_i32, %c0_i32_0 : i32, i32
  }
  func.func @transform_2(%arg0: i32) -> (i32, i32) {
    %c0_i32 = arith.constant 0 : i32
    %c0_i32_0 = arith.constant 0 : i32
    %c0_i32_1 = arith.constant 0 : i32
    return %c0_i32, %c0_i32_0 : i32, i32
  }
  func.func @transform_3(%arg0: i32) -> (i32, i32) {
    %c0_i32 = arith.constant 0 : i32
    %c0_i32_0 = arith.constant 0 : i32
    %c0_i32_1 = arith.constant 0 : i32
    return %c0_i32, %c0_i32_0 : i32, i32
  }
  func.func @transform_4(%arg0: i32) -> (i32, i32) {
    %c0_i32 = arith.constant 0 : i32
    %c0_i32_0 = arith.constant 0 : i32
    %c0_i32_1 = arith.constant 0 : i32
    return %c0_i32, %c0_i32_0 : i32, i32
  }
  func.func @transform_5(%arg0: i32) -> (i32, i32) {
    %c0_i32 = arith.constant 0 : i32
    %c0_i32_0 = arith.constant 0 : i32
    %c0_i32_1 = arith.constant 0 : i32
    return %c0_i32, %c0_i32_0 : i32, i32
  }
  func.func @transform_6(%arg0: i32) -> (i32, i32) {
    %c0_i32 = arith.constant 0 : i32
    %c0_i32_0 = arith.constant 0 : i32
    %c0_i32_1 = arith.constant 0 : i32
    return %c0_i32, %c0_i32_0 : i32, i32
  }
  func.func @transform_7(%arg0: i32) -> (i32, i32) {
    %c0_i32 = arith.constant 0 : i32
    %c0_i32_0 = arith.constant 0 : i32
    %c0_i32_1 = arith.constant 0 : i32
    return %c0_i32, %c0_i32_0 : i32, i32
  }
  func.func @transform_8(%arg0: i32) -> (i32, i32) {
    %c0_i32 = arith.constant 0 : i32
    %c0_i32_0 = arith.constant 0 : i32
    %c0_i32_1 = arith.constant 0 : i32
    return %c0_i32, %c0_i32_0 : i32, i32
  }
  func.func @transform_9(%arg0: i32) -> (i32, i32) {
    %c0_i32 = arith.constant 0 : i32
    %c0_i32_0 = arith.constant 0 : i32
    %c0_i32_1 = arith.constant 0 : i32
    return %c0_i32, %c0_i32_0 : i32, i32
  }
  func.func @transform_10(%arg0: i32) -> (i32, i32) {
    %c0_i32 = arith.constant 0 : i32
    %c0_i32_0 = arith.constant 0 : i32
    %c0_i32_1 = arith.constant 0 : i32
    return %c0_i32, %c0_i32_0 : i32, i32
  }
  func.func @transform_11(%arg0: i32) -> (i32, i32) {
    %c0_i32 = arith.constant 0 : i32
    %c0_i32_0 = arith.constant 0 : i32
    %c0_i32_1 = arith.constant 0 : i32
    return %c0_i32, %c0_i32_0 : i32, i32
  }
  func.func @transform_12(%arg0: i32) -> (i32, i32) {
    %c0_i32 = arith.constant 0 : i32
    %c0_i32_0 = arith.constant 0 : i32
    %c0_i32_1 = arith.constant 0 : i32
    return %c0_i32, %c0_i32_0 : i32, i32
  }
}

</mosaic_0001>

<bundles_post_ra>
// kernel: demonstration_recurrent_q_forward.1
= control target key start
LH: loop header
LB: loop body
LE: loop exit
PB: predicated region body
PF: predicated region fallthrough
CT: control target
= control target key end

     0   :  { %17 = vsyncpa [#allocation3], 0  ;;  %s2939_s0 = inlined_call_operand.vmem [shape: f32[48,8], index: 0, kind: input, shape index: {}]   ;;  %s2940_s1 = inlined_call_operand.vmem [shape: f32[8,8], index: 1, kind: input, shape index: {}]   ;;  %s2941_s2 = inlined_call_operand.hbm [shape: f32[8,512], index: 2, kind: input, shape index: {}]   ;;  %s2942_s3 = inlined_call_operand.vmem [shape: bf16[128,512], index: 3, kind: input, shape index: {}]   ;;  %s2943_s4 = inlined_call_operand.vmem [shape: f32[1,512], index: 4, kind: input, shape index: {}]   ;;  %s2944_s5 = inlined_call_operand.hbm [shape: f32[8,128], index: 5, kind: input, shape index: {}]   ;;  %s2945_s6 = inlined_call_operand.vmem [shape: bf16[128,128], index: 6, kind: input, shape index: {}]   ;;  %s2946_s7 = inlined_call_operand.hbm [shape: f32[1,128], index: 7, kind: input, shape index: {}]   ;;  %s2947_s8 = inlined_call_operand.hbm [shape: bf16[128,128], index: 8, kind: input, shape index: {}]   ;;  %s2948_s9 = inlined_call_operand.hbm [shape: f32[1,128], index: 9, kind: input, shape index: {}]   ;;  %s2949_s10 = inlined_call_operand.hbm [shape: bf16[128,128], index: 10, kind: input, shape index: {}]   ;;  %s2950_s11 = inlined_call_operand.hbm [shape: f32[1,128], index: 11, kind: input, shape index: {}]   ;;  %s2951_s12 = inlined_call_operand.vmem [shape: f32[8,128], index: 12, kind: output, shape index: {}]  }
   0x1   :  { %18 = vsyncpa [#allocation5], 0 }
   0x2   :  { %19 = vsyncpa [#allocation8], 0 }
   0x3   :  { %20 = vsyncpa [#allocation11], 0  ;;  %s2196_s21 = smov [#allocation4]   ;;  %s2197_s23 = smov [#allocation7]  }
   0x4   :  { %s45_s22 = sshll.u32 %s2196_s21, 4  ;;  %s66_s24 = sshll.u32 %s2197_s23, 4  ;;  %s46_s22 = int_to_ptr.vmem [resolvable:$true] %s45_s22  ;;  %s2273_s24 = int_to_ptr.vmem [resolvable:$true] %s66_s24 }
   0x5   :  { %s2034_s27 = scalar_lea.hbm %s2944_s5, 128 }
   0x6   :  { %p2035_p0 = scmp.ne.s32.totalorder %s2944_s5, %s2034_s27  ;;  %p2038_p1 = scmp.lt.u32.totalorder %s2034_s27, %s2944_s5 }
   0x8   :  { %p2040_p2 = pnand %p2038_p1, %p2035_p0 }
   0xa   :  { %2043 = shalt.err (!%p2040_p2)
}
   0xb   :  { %s2044_s14 = scalar_lea.vmem %s46_s22, 128  ;;  %p2049_p4 = scmp.lt.s32.totalorder %s46_s22, %s46_s22 }
   0xc   :  { %p2045_p3 = scmp.ne.s32.totalorder %s46_s22, %s2044_s14  ;;  %p2050_p5 = scmp.lt.s32.totalorder %s2044_s14, %s2044_s14 }
   0xe   :  { %p2051_p6 = por %p2050_p5, %p2049_p4 }
  0x10   :  { %p2052_p7 = pnand %p2051_p6, %p2045_p3 }
  0x12   :  { %2055 = shalt.err (!%p2052_p7)
}
  0x13   :  { %48 = dma.hbm_to_vmem [thread:$0]  %s2944_s5, 128, %s46_s22, [#allocation5]  }
  0x14   :  { %s2056_s19 = scalar_lea.hbm %s2947_s8, 1024 }
  0x15   :  { %p2057_p8 = scmp.ne.s32.totalorder %s2947_s8, %s2056_s19  ;;  %p2060_p9 = scmp.lt.u32.totalorder %s2056_s19, %s2947_s8 }
  0x17   :  { %p2062_p10 = pnand %p2060_p9, %p2057_p8 }
  0x19   :  { %2065 = shalt.err (!%p2062_p10)
}
  0x1a   :  { %s2066_s26 = scalar_lea.vmem %s2273_s24, 1024  ;;  %p2071_p12 = scmp.lt.s32.totalorder %s2273_s24, %s2273_s24 }
  0x1b   :  { %p2067_p11 = scmp.ne.s32.totalorder %s2273_s24, %s2066_s26  ;;  %p2072_p13 = scmp.lt.s32.totalorder %s2066_s26, %s2066_s26 }
  0x1d   :  { %p2073_p0 = por %p2072_p13, %p2071_p12 }
  0x1f   :  { %p2074_p1 = pnand %p2073_p0, %p2067_p11 }
  0x21   :  { %2077 = shalt.err (!%p2074_p1)
}
  0x22   :  { %s2198_s5 = smov 64   ;;  %s2199_s22 = smov 4  }
  0x23   :  { %72 = dma.hbm_to_vmem [thread:$0]  %s2947_s8, 1024, %s2273_s24, [#allocation8], %s2198_s5, %s2198_s5, %s2199_s22  }
  0x24   :  { %s2200_s29 = smov [#allocation10]   ;;  %s2201_s13 = smov [#allocation2]  }
  0x25   :  { %s88_s30 = sshll.u32 %s2200_s29, 4  ;;  %s31_s14 = sshll.u32 %s2201_s13, 4  ;;  %s89_s30 = int_to_ptr.vmem [resolvable:$true] %s88_s30  ;;  %s32_s14 = int_to_ptr.vmem [resolvable:$true] %s31_s14 }
  0x26   :  { %s2078_s17 = scalar_lea.hbm %s2949_s10, 1024 }
  0x27   :  { %p2079_p2 = scmp.ne.s32.totalorder %s2949_s10, %s2078_s17  ;;  %p2082_p3 = scmp.lt.u32.totalorder %s2078_s17, %s2949_s10 }
  0x29   :  { %p2084_p4 = pnand %p2082_p3, %p2079_p2 }
  0x2b   :  { %2087 = shalt.err (!%p2084_p4)
}
  0x2c   :  { %s2088_s8 = scalar_lea.vmem %s89_s30, 1024  ;;  %p2093_p6 = scmp.lt.s32.totalorder %s89_s30, %s89_s30 }
  0x2d   :  { %p2089_p5 = scmp.ne.s32.totalorder %s89_s30, %s2088_s8  ;;  %p2094_p7 = scmp.lt.s32.totalorder %s2088_s8, %s2088_s8 }
  0x2f   :  { %p2095_p8 = por %p2094_p7, %p2093_p6 }
  0x31   :  { %p2096_p9 = pnand %p2095_p8, %p2089_p5 }
  0x33   :  { %2099 = shalt.err (!%p2096_p9)
}
  0x34   :  { %94 = dma.hbm_to_vmem [thread:$0]  %s2949_s10, 1024, %s89_s30, [#allocation11], %s2198_s5, %s2198_s5, %s2199_s22  }
  0x35   :  { %s2100_s27 = scalar_lea.hbm %s2941_s2, 512 }
  0x36   :  { %p2101_p10 = scmp.ne.s32.totalorder %s2941_s2, %s2100_s27  ;;  %p2104_p11 = scmp.lt.u32.totalorder %s2100_s27, %s2941_s2 }
  0x38   :  { %p2106_p12 = pnand %p2104_p11, %p2101_p10 }
  0x3a   :  { %2109 = shalt.err (!%p2106_p12)
}
  0x3b   :  { %s2110_s16 = scalar_lea.vmem %s32_s14, 512  ;;  %p2115_p0 = scmp.lt.s32.totalorder %s32_s14, %s32_s14 }
  0x3c   :  { %p2111_p13 = scmp.ne.s32.totalorder %s32_s14, %s2110_s16  ;;  %p2116_p1 = scmp.lt.s32.totalorder %s2110_s16, %s2110_s16 }
  0x3e   :  { %p2117_p2 = por %p2116_p1, %p2115_p0 }
  0x40   :  { %p2118_p3 = pnand %p2117_p2, %p2111_p13 }
  0x42   :  { %2121 = shalt.err (!%p2118_p3)
}
  0x43   :  { %34 = dma.hbm_to_vmem [thread:$0]  %s2941_s2, 512, %s32_s14, [#allocation3]  }
  0x44   :  { %s2202_s22 = smov [#allocation6]   ;;  %s2203_s17 = smov [#allocation9]  }
  0x45   :  { %s57_s30 = sshll.u32 %s2202_s22, 4  ;;  %s79_s18 = sshll.u32 %s2203_s17, 4  ;;  %s58_s30 = int_to_ptr.vmem [resolvable:$true] %s57_s30  ;;  %s80_s18 = int_to_ptr.vmem [resolvable:$true] %s79_s18 }
  0x46   :  { %s2122_s21 = scalar_lea.hbm %s2946_s7, 16 }
  0x47   :  { %p2123_p4 = scmp.ne.s32.totalorder %s2946_s7, %s2122_s21  ;;  %p2126_p5 = scmp.lt.u32.totalorder %s2122_s21, %s2946_s7 }
  0x49   :  { %p2128_p6 = pnand %p2126_p5, %p2123_p4 }
  0x4b   :  { %2131 = shalt.err (!%p2128_p6)
}
  0x4c   :  { %s2132_s2 = scalar_lea.vmem %s58_s30, 16  ;;  %s2136_s14 = scalar_lea.vmem %s58_s30, 32 }
  0x4d   :  { %p2133_p7 = scmp.ne.s32.totalorder %s58_s30, %s2132_s2  ;;  %p2137_p8 = scmp.lt.s32.totalorder %s58_s30, %s58_s30 }
  0x4e   :  { %p2138_p9 = scmp.lt.s32.totalorder %s2136_s14, %s2132_s2 }
  0x50   :  { %p2139_p10 = por %p2138_p9, %p2137_p8 }
  0x52   :  { %p2140_p11 = pnand %p2139_p10, %p2133_p7 }
  0x54   :  { %2143 = shalt.err (!%p2140_p11)
}
  0x55   :  { %60 = dma.hbm_to_vmem [thread:$0]  %s2946_s7, 16, %s58_s30, [#allocation5]  }
  0x56   :  { %s2144_s13 = scalar_lea.hbm %s2948_s9, 16 }
  0x57   :  { %p2145_p12 = scmp.ne.s32.totalorder %s2948_s9, %s2144_s13  ;;  %p2148_p13 = scmp.lt.u32.totalorder %s2144_s13, %s2948_s9 }
  0x59   :  { %p2150_p0 = pnand %p2148_p13, %p2145_p12 }
  0x5b   :  { %2153 = shalt.err (!%p2150_p0)
}
  0x5c   :  { %s2154_s22 = scalar_lea.vmem %s80_s18, 16  ;;  %s2158_s17 = scalar_lea.vmem %s80_s18, 32 }
  0x5d   :  { %p2155_p1 = scmp.ne.s32.totalorder %s80_s18, %s2154_s22  ;;  %p2159_p2 = scmp.lt.s32.totalorder %s80_s18, %s80_s18 }
  0x5e   :  { %p2160_p3 = scmp.lt.s32.totalorder %s2158_s17, %s2154_s22 }
  0x60   :  { %p2161_p4 = por %p2160_p3, %p2159_p2 }
  0x62   :  { %p2162_p5 = pnand %p2161_p4, %p2155_p1 }
  0x64   :  { %2165 = shalt.err (!%p2162_p5)
}
  0x65   :  { %82 = dma.hbm_to_vmem [thread:$0]  %s2948_s9, 16, %s80_s18, [#allocation8]  }
  0x66   :  { %s2204_s19 = smov [#allocation12]   ;;  %s2166_s24 = scalar_lea.hbm %s2950_s11, 16 }
  0x67   :  { %s101_s20 = sshll.u32 %s2204_s19, 4  ;;  %p2167_p6 = scmp.ne.s32.totalorder %s2950_s11, %s2166_s24  ;;  %s102_s20 = int_to_ptr.vmem [resolvable:$true] %s101_s20 }
  0x68   :  { %p2170_p7 = scmp.lt.u32.totalorder %s2166_s24, %s2950_s11 }
  0x6a   :  { %p2172_p8 = pnand %p2170_p7, %p2167_p6 }
  0x6c   :  { %2175 = shalt.err (!%p2172_p8)
}
  0x6d   :  { %s2176_s26 = scalar_lea.vmem %s102_s20, 16  ;;  %s2180_s9 = scalar_lea.vmem %s102_s20, 32 }
  0x6e   :  { %p2177_p9 = scmp.ne.s32.totalorder %s102_s20, %s2176_s26  ;;  %p2181_p10 = scmp.lt.s32.totalorder %s102_s20, %s102_s20 }
  0x6f   :  { %p2182_p11 = scmp.lt.s32.totalorder %s2180_s9, %s2176_s26 }
  0x71   :  { %p2183_p12 = por %p2182_p11, %p2181_p10 }
  0x73   :  { %p2184_p13 = pnand %p2183_p12, %p2177_p9 }
  0x75   :  { %2187 = shalt.err (!%p2184_p13)
}
  0x76   :  { %104 = dma.hbm_to_vmem [thread:$0]  %s2950_s11, 16, %s102_s20, [#allocation11]  }
  0x77   :  { %2188 = dma.done.wait [#allocation3], 512  }
  0x78   :  { %2189 = vsyncadd [#allocation3], 4294966784 }
  0x79   :  { %2190 = dma.done.wait [#allocation5], 144  }
  0x7a   :  { %2191 = vsyncadd [#allocation5], 4294967152 }
  0x7b   :  { %2192 = dma.done.wait [#allocation8], 1040  }
  0x7c   :  { %2193 = vsyncadd [#allocation8], 4294966256 }
  0x7d   :  { %2194 = dma.done.wait [#allocation11], 1040  }
  0x7e   :  { %2195 = vsyncadd [#allocation11], 4294966256  ;;  %v2952_v0 = vmov 0.0   ;;  %v134_v1 = vld [vmem:[#allocation2 + $0x8] sm:$0xff]  ;;  %v136_v2 = vld [vmem:[#allocation2 + $0x18] sm:$0xff]  ;;  %vm159_vm0 = vcmask 64512   ;;  %v139_v44 = vlaneseq }
  0x7f   :  { %242 = vmatprep.mubr.f32.mxu0 %v2952_v0  ;;  %343 = vmatprep.mubr.f32.mxu1 %v2952_v0  ;;  %v133_v3 = vld [vmem:[#allocation2] sm:$0xff]  ;;  %v135_v4 = vld [vmem:[#allocation2 + $0x10] sm:$0xff]  ;;  %v2378_v7 = vld [vmem:[%s2942_s3 + $0xc] ss:$16 sps:$4 sm:$0xff]   ;;  %v2954_v43 = vmov 0   ;;  %vm2207_vm1 = vmmov 0  }
  0x80   :  { %178 = vmatprep.subr.mxu0 %v134_v1  ;;  %279 = vmatprep.subr.mxu1 %v136_v2  ;;  %v127_v5 = vld [vmem:[%s2939_s0] sm:$0xff]  ;;  %v2390_v9 = vld [vmem:[%s2942_s3 + $0x8] ss:$16 sps:$4 sm:$0xff]   ;;  %v2404_v11 = vld [vmem:[%s2942_s3 + $0x2c] ss:$16 sps:$4 sm:$0xff]   ;;  %v140_v45 = vshrl.u32 %v139_v44, 7 }
  0x81   :  { %179 = vmatpush1.msra.mxu0 %v133_v3  ;;  %280 = vmatpush1.msra.mxu1 %v135_v4  ;;  %v2372_v6 = vld [vmem:[%s2942_s3 + $0x4] ss:$16 sps:$4 sm:$0xff]   ;;  %v2384_v8 = vld [vmem:[%s2942_s3] ss:$16 sps:$4 sm:$0xff]   ;;  %v2414_v13 = vld [vmem:[%s2942_s3 + $0x28] ss:$16 sps:$4 sm:$0xff]  }
  0x82   :  { %1660 = vmatmul.mubr.msk.f32.vlgmr.msra.gmra.mrb[0].mxu0 %vm159_vm0, %v127_v5  ;;  %1666 = vmatmul.mubr.msk.f32.vlgmr.msra.gmra.mrb[0].mxu1 %vm159_vm0, %v127_v5  ;;  %v2398_v10 = vld [vmem:[%s2942_s3 + $0x24] ss:$16 sps:$4 sm:$0xff]   ;;  %v2409_v12 = vld [vmem:[%s2942_s3 + $0x20] ss:$16 sps:$4 sm:$0xff]   ;;  %v2427_v15 = vld [vmem:[%s2942_s3 + $0x4c] ss:$16 sps:$4 sm:$0xff]  }
  0x83   :  { %572 = vmatprep.subr.bf16.mxu0 %v2372_v6  ;;  %248 = vmatprep.mubr.f32.mxu0 %v2952_v0  ;;  %v2421_v14 = vld [vmem:[%s2942_s3 + $0x44] ss:$16 sps:$4 sm:$0xff]   ;;  %v2433_v16 = vld [vmem:[%s2942_s3 + $0x40] ss:$16 sps:$4 sm:$0xff]   ;;  %v2438_v17 = vld [vmem:[%s2942_s3 + $0x48] ss:$16 sps:$4 sm:$0xff]  }
  0x84   :  { %613 = vmatprep.subr.bf16.mxu1 %v2378_v7  ;;  %573 = vmatpush1.bf16.msra.mxu0 %v2384_v8  ;;  %v128_v18 = vld [vmem:[%s2939_s0 + $0x8] sm:$0xff]  ;;  %v2448_v19 = vld [vmem:[%s2942_s3 + $0x64] ss:$16 sps:$4 sm:$0xff]   ;;  %v2461_v21 = vld [vmem:[%s2942_s3 + $0x60] ss:$16 sps:$4 sm:$0xff]   ;;  %v141_v50 = vsub.s32 0, %v140_v45 }
  0x85   :  { %614 = vmatpush1.bf16.msra.mxu1 %v2390_v9  ;;  %349 = vmatprep.mubr.f32.mxu1 %v2952_v0  ;;  %v2455_v20 = vld [vmem:[%s2942_s3 + $0x6c] ss:$16 sps:$4 sm:$0xff]   ;;  %v129_v22 = vld [vmem:[%s2939_s0 + $0x10] sm:$0xff]  ;;  %v2471_v23 = vld [vmem:[%s2942_s3 + $0x68] ss:$16 sps:$4 sm:$0xff]   ;;  %v145_v52 = vsub.s32 1, %v140_v45 }
  0x86   :  { %574 = vmatprep.subr.bf16.mxu0 %v2398_v10  ;;  %615 = vmatprep.subr.bf16.mxu1 %v2404_v11  ;;  %v2479_v24 = vld [vmem:[%s2942_s3 + $0x84] ss:$16 sps:$4 sm:$0xff]   ;;  %v2486_v25 = vld [vmem:[%s2942_s3 + $0x8c] ss:$16 sps:$4 sm:$0xff]   ;;  %v2497_v27 = vld [vmem:[%s2942_s3 + $0x80] ss:$16 sps:$4 sm:$0xff]  }
  0x87   :  { %1661 = vmatmul.mubr.msk.f32.gmra.mrb[2].mxu0 %vm159_vm0, %v128_v18  ;;  %1667 = vmatmul.mubr.msk.f32.gmra.mrb[2].mxu1 %vm159_vm0, %v128_v18  ;;  %v130_v26 = vld [vmem:[%s2939_s0 + $0x18] sm:$0xff]  ;;  %v2510_v29 = vld [vmem:[%s2942_s3 + $0xa4] ss:$16 sps:$4 sm:$0xff]   ;;  %v2528_v32 = vld [vmem:[%s2942_s3 + $0xa0] ss:$16 sps:$4 sm:$0xff]   ;;  %v149_v53 = vsub.s32 2, %v140_v45 }
  0x88   :  { %575 = vmatpush1.bf16.msra.mxu0 %v2409_v12  ;;  %254 = vmatprep.mubr.f32.mxu0 %v2952_v0  ;;  %v2505_v28 = vld [vmem:[%s2942_s3 + $0x88] ss:$16 sps:$4 sm:$0xff]   ;;  %v2517_v30 = vld [vmem:[%s2942_s3 + $0xac] ss:$16 sps:$4 sm:$0xff]   ;;  %v131_v31 = vld [vmem:[%s2939_s0 + $0x20] sm:$0xff]  ;;  %v153_v54 = vsub.s32 3, %v140_v45 }
  0x89   :  { %616 = vmatpush1.bf16.msra.mxu1 %v2414_v13  ;;  %576 = vmatprep.subr.bf16.mxu0 %v2421_v14  ;;  %v2533_v33 = vld [vmem:[%s2942_s3 + $0xa8] ss:$16 sps:$4 sm:$0xff]   ;;  %v2539_v34 = vld [vmem:[%s2942_s3 + $0xc4] ss:$16 sps:$4 sm:$0xff]   ;;  %v2546_v35 = vld [vmem:[%s2942_s3 + $0xcc] ss:$16 sps:$4 sm:$0xff]  }
  0x8a   :  { %617 = vmatprep.subr.bf16.mxu1 %v2427_v15  ;;  %355 = vmatprep.mubr.f32.mxu1 %v2952_v0  ;;  %v2553_v36 = vld [vmem:[%s2942_s3 + $0xc0] ss:$16 sps:$4 sm:$0xff]   ;;  %v2559_v37 = vld [vmem:[%s2942_s3 + $0xc8] ss:$16 sps:$4 sm:$0xff]   ;;  %v2568_v39 = vld [vmem:[%s2942_s3 + $0xe4] ss:$16 sps:$4 sm:$0xff]  }
  0x8b   :  { %1662 = vmatmul.mubr.msk.f32.gmra.mrb[4].mxu0 %vm159_vm0, %v129_v22  ;;  %1668 = vmatmul.mubr.msk.f32.gmra.mrb[4].mxu1 %vm159_vm0, %v129_v22  ;;  %v132_v38 = vld [vmem:[%s2939_s0 + $0x28] sm:$0xff]  ;;  %v2584_v41 = vld [vmem:[%s2942_s3 + $0xe0] ss:$16 sps:$4 sm:$0xff]  }
  0x8c   :  { %577 = vmatpush1.bf16.msra.mxu0 %v2433_v16  ;;  %260 = vmatprep.mubr.f32.mxu0 %v2952_v0  ;;  %v2575_v40 = vld [vmem:[%s2942_s3 + $0xec] ss:$16 sps:$4 sm:$0xff]   ;;  %v2590_v42 = vld [vmem:[%s2942_s3 + $0xe8] ss:$16 sps:$4 sm:$0xff]   ;;  %v137_v51 = vld [vmem:[%s2943_s4] sm:$0xf] }
  0x8d   :  { %618 = vmatpush1.bf16.msra.mxu1 %v2438_v17  ;;  %578 = vmatprep.subr.bf16.mxu0 %v2448_v19  ;;  %v142_v55 = vrot.slane %v137_v51, %v141_v50  ;;  %v146_v56 = vrot.slane %v137_v51, %v145_v52  ;;  %v150_v58 = vrot.slane %v137_v51, %v149_v53 }
  0x8e   :  { %619 = vmatprep.subr.bf16.mxu1 %v2455_v20  ;;  %361 = vmatprep.mubr.f32.mxu1 %v2952_v0  ;;  %v154_v61 = vrot.slane %v137_v51, %v153_v54 }
  0x8f   :  { %1663 = vmatmul.mubr.msk.f32.gmra.mrb[6].mxu0 %vm159_vm0, %v130_v26  ;;  %1669 = vmatmul.mubr.msk.f32.gmra.mrb[6].mxu1 %vm159_vm0, %v130_v26 }
  0x90   :  { %579 = vmatpush1.bf16.msra.mxu0 %v2461_v21  ;;  %266 = vmatprep.mubr.f32.mxu0 %v2952_v0 }
  0x91   :  { %620 = vmatpush1.bf16.msra.mxu1 %v2471_v23  ;;  %580 = vmatprep.subr.bf16.mxu0 %v2479_v24 }
  0x92   :  { %621 = vmatprep.subr.bf16.mxu1 %v2486_v25  ;;  %367 = vmatprep.mubr.f32.mxu1 %v2952_v0 }
  0x93   :  { %1664 = vmatmul.mubr.msk.f32.gmra.mrb[8].mxu0 %vm159_vm0, %v131_v31  ;;  %1670 = vmatmul.mubr.msk.f32.gmra.mrb[8].mxu1 %vm159_vm0, %v131_v31 }
  0x94   :  { %581 = vmatpush1.bf16.msra.mxu0 %v2497_v27  ;;  %272 = vmatprep.mubr.f32.mxu0 %v2952_v0 }
  0x95   :  { %622 = vmatpush1.bf16.msra.mxu1 %v2505_v28  ;;  %582 = vmatprep.subr.bf16.mxu0 %v2510_v29 }
  0x96   :  { %623 = vmatprep.subr.bf16.mxu1 %v2517_v30  ;;  %373 = vmatprep.mubr.f32.mxu1 %v2952_v0 }
  0x97   :  { %1665 = vmatmul.mubr.msk.f32.gmra.mrb[10].mxu0 %vm159_vm0, %v132_v38  ;;  %1671 = vmatmul.mubr.msk.f32.gmra.mrb[10].mxu1 %vm159_vm0, %v132_v38 }
  0x98   :  { %583 = vmatpush1.bf16.msra.mxu0 %v2528_v32  ;;  %604 = vmatprep.mubr.bf16.mxu0 %v2954_v43 }
  0x99   :  { %624 = vmatpush1.bf16.msra.mxu1 %v2533_v33  ;;  %584 = vmatprep.subr.bf16.mxu0 %v2539_v34 }
  0x9a   :  { %625 = vmatprep.subr.bf16.mxu1 %v2546_v35  ;;  %645 = vmatprep.mubr.bf16.mxu1 %v2954_v43 }
  0x9c   :  { %585 = vmatpush1.bf16.msra.mxu0 %v2553_v36 }
  0x9d   :  { %626 = vmatpush1.bf16.msra.mxu1 %v2559_v37  ;;  %586 = vmatprep.subr.bf16.mxu0 %v2568_v39 }
  0x9e   :  { %627 = vmatprep.subr.bf16.mxu1 %v2575_v40 }
  0xa0   :  { %587 = vmatpush1.bf16.msra.mxu0 %v2584_v41 }
  0xa1   :  { %628 = vmatpush1.bf16.msra.mxu1 %v2590_v42  ;;  %683 = vmatprep.subr.bf16.mxu0 %v2372_v6 }
  0xa2   :  { %724 = vmatprep.subr.bf16.mxu1 %v2378_v7 }
  0xa3   :  { %605 = vmatmul.mubr.bf16.vlgmr.msra.gmra.mrb[12].mxu0 %v2954_v43 }
  0xa4   :  { %646 = vmatmul.mubr.bf16.vlgmr.msra.gmra.mrb[12].mxu1 %v2954_v43  ;;  %684 = vmatpush1.bf16.msra.mxu0 %v2384_v8 }
  0xa5   :  { %725 = vmatpush1.bf16.msra.mxu1 %v2390_v9  ;;  %685 = vmatprep.subr.bf16.mxu0 %v2398_v10 }
  0xa6   :  { %726 = vmatprep.subr.bf16.mxu1 %v2404_v11  ;;  %715 = vmatprep.mubr.bf16.mxu0 %v2954_v43 }
  0xa7   :  { %756 = vmatprep.mubr.bf16.mxu1 %v2954_v43 }
  0xa8   :  { %686 = vmatpush1.bf16.msra.mxu0 %v2409_v12 }
  0xa9   :  { %727 = vmatpush1.bf16.msra.mxu1 %v2414_v13  ;;  %687 = vmatprep.subr.bf16.mxu0 %v2421_v14 }
  0xaa   :  { %728 = vmatprep.subr.bf16.mxu1 %v2427_v15 }
  0xac   :  { %688 = vmatpush1.bf16.msra.mxu0 %v2433_v16 }
  0xad   :  { %729 = vmatpush1.bf16.msra.mxu1 %v2438_v17  ;;  %689 = vmatprep.subr.bf16.mxu0 %v2448_v19 }
  0xae   :  { %730 = vmatprep.subr.bf16.mxu1 %v2455_v20 }
  0xb0   :  { %690 = vmatpush1.bf16.msra.mxu0 %v2461_v21 }
  0xb1   :  { %731 = vmatpush1.bf16.msra.mxu1 %v2471_v23  ;;  %691 = vmatprep.subr.bf16.mxu0 %v2479_v24 }
  0xb2   :  { %732 = vmatprep.subr.bf16.mxu1 %v2486_v25 }
  0xb4   :  { %692 = vmatpush1.bf16.msra.mxu0 %v2497_v27 }
  0xb5   :  { %733 = vmatpush1.bf16.msra.mxu1 %v2505_v28  ;;  %693 = vmatprep.subr.bf16.mxu0 %v2510_v29 }
  0xb6   :  { %734 = vmatprep.subr.bf16.mxu1 %v2517_v30 }
  0xb8   :  { %694 = vmatpush1.bf16.msra.mxu0 %v2528_v32 }
  0xb9   :  { %735 = vmatpush1.bf16.msra.mxu1 %v2533_v33  ;;  %695 = vmatprep.subr.bf16.mxu0 %v2539_v34 }
  0xba   :  { %736 = vmatprep.subr.bf16.mxu1 %v2546_v35 }
  0xbc   :  { %696 = vmatpush1.bf16.msra.mxu0 %v2553_v36 }
  0xbd   :  { %737 = vmatpush1.bf16.msra.mxu1 %v2559_v37  ;;  %697 = vmatprep.subr.bf16.mxu0 %v2568_v39 }
  0xbe   :  { %738 = vmatprep.subr.bf16.mxu1 %v2575_v40 }
  0xc0   :  { %698 = vmatpush1.bf16.msra.mxu0 %v2584_v41 }
  0xc1   :  { %739 = vmatpush1.bf16.msra.mxu1 %v2590_v42  ;;  %794 = vmatprep.subr.bf16.mxu0 %v2372_v6 }
  0xc2   :  { %835 = vmatprep.subr.bf16.mxu1 %v2378_v7 }
 0x155   :  { %v244_v46 = vpop.f32.mrb[0].mxu0  ;;  %v345_v47 = vpop.f32.mrb[0].mxu1 }
 0x156   :  { %v246_v48 = vpop.f32.mrb[1].mxu0  ;;  %v347_v49 = vpop.f32.mrb[1].mxu1 }
 0x15a   :  { %v250_v57 = vpop.f32.mrb[2].mxu0  ;;  %v351_v62 = vpop.f32.mrb[2].mxu1 }
 0x15b   :  { %v2641_v59 = vadd.f32 %v250_v57, %v142_v55  ;;  %v252_v60 = vpop.f32.mrb[3].mxu0  ;;  %v2645_v1 = vadd.f32 %v351_v62, %v150_v58  ;;  %v353_v2 = vpop.f32.mrb[3].mxu1 }
 0x15c   :  { %v2643_v63 = vadd.f32 %v252_v60, %v146_v56  ;;  %v2647_v3 = vadd.f32 %v353_v2, %v154_v61 }
 0x15e   :  { %v256_v4 = vpop.f32.mrb[4].mxu0  ;;  %v357_v22 = vpop.f32.mrb[4].mxu1 }
 0x15f   :  { %v2649_v5 = vadd.f32 %v256_v4, %v142_v55  ;;  %v258_v18 = vpop.f32.mrb[5].mxu0  ;;  %v2653_v31 = vadd.f32 %v357_v22, %v150_v58  ;;  %v359_v38 = vpop.f32.mrb[5].mxu1 }
 0x160   :  { %v2651_v26 = vadd.f32 %v258_v18, %v146_v56  ;;  %v2655_v44 = vadd.f32 %v359_v38, %v154_v61 }
 0x161   :  { %2956 = vst [vmem:[#allocation17_spill] sm:$0xff] %v2649_v5  ;;  %2958 = vst [vmem:[#allocation19_spill] sm:$0xff] %v2653_v31 }
 0x162   :  { %2957 = vst [vmem:[#allocation18_spill] sm:$0xff] %v2651_v26  ;;  %2959 = vst [vmem:[#allocation20_spill] sm:$0xff] %v2655_v44  ;;  %v262_v45 = vpop.f32.mrb[6].mxu0  ;;  %v363_v52 = vpop.f32.mrb[6].mxu1 }
 0x163   :  { %v2657_v50 = vadd.f32 %v262_v45, %v142_v55  ;;  %v264_v51 = vpop.f32.mrb[7].mxu0  ;;  %v2661_v54 = vadd.f32 %v363_v52, %v150_v58  ;;  %v365_v57 = vpop.f32.mrb[7].mxu1 }
 0x164   :  { %v2659_v53 = vadd.f32 %v264_v51, %v146_v56  ;;  %v2663_v60 = vadd.f32 %v365_v57, %v154_v61 }
 0x165   :  { %2960 = vst [vmem:[#allocation21_spill] sm:$0xff] %v2657_v50  ;;  %2962 = vst [vmem:[#allocation23_spill] sm:$0xff] %v2661_v54 }
 0x166   :  { %2961 = vst [vmem:[#allocation22_spill] sm:$0xff] %v2659_v53  ;;  %2963 = vst [vmem:[#allocation24_spill] sm:$0xff] %v2663_v60  ;;  %v268_v62 = vpop.f32.mrb[8].mxu0  ;;  %v369_v18 = vpop.f32.mrb[8].mxu1  ;;  %v245_v60 = vadd.f32 %v244_v46, %v142_v55 }
 0x167   :  { %v2665_v2 = vadd.f32 %v268_v62, %v142_v55  ;;  %v270_v4 = vpop.f32.mrb[9].mxu0  ;;  %v2669_v38 = vadd.f32 %v369_v18, %v150_v58  ;;  %v371_v45 = vpop.f32.mrb[9].mxu1 }
 0x168   :  { %v2667_v22 = vadd.f32 %v270_v4, %v146_v56  ;;  %v2671_v0 = vadd.f32 %v371_v45, %v154_v61  ;;  %v247_v4 = vadd.f32 %v246_v48, %v146_v56 }
 0x169   :  { %2964 = vst [vmem:[#allocation25_spill] sm:$0xff] %v2665_v2  ;;  %2966 = vst [vmem:[#allocation27_spill] sm:$0xff] %v2669_v38  ;;  %v348_v38 = vadd.f32 %v347_v49, %v154_v61 }
 0x16a   :  { %2965 = vst [vmem:[#allocation26_spill] sm:$0xff] %v2667_v22  ;;  %2967 = vst [vmem:[#allocation28_spill] sm:$0xff] %v2671_v0  ;;  %v274_v43 = vpop.f32.mrb[10].mxu0  ;;  %v375_v53 = vpop.f32.mrb[10].mxu1  ;;  %v346_v22 = vadd.f32 %v345_v47, %v150_v58 }
 0x16b   :  { %v2673_v51 = vadd.f32 %v274_v43, %v142_v55  ;;  %v276_v52 = vpop.f32.mrb[11].mxu0  ;;  %v2677_v57 = vadd.f32 %v375_v53, %v150_v58  ;;  %v377_v62 = vpop.f32.mrb[11].mxu1 }
 0x16c   :  { %v2675_v54 = vadd.f32 %v276_v52, %v146_v56  ;;  %v2679_v2 = vadd.f32 %v377_v62, %v154_v61 }
 0x16d   :  { %2968 = vst [vmem:[#allocation29_spill] sm:$0xff] %v2673_v51  ;;  %2970 = vst [vmem:[#allocation31_spill] sm:$0xff] %v2677_v57 }
 0x16e   :  { %2969 = vst [vmem:[#allocation30_spill] sm:$0xff] %v2675_v54 }
 0x176   :  { %v606_v18 = vpop.f32.mrb[12].mxu0 }
 0x177   :  { %v654_v50 = vadd.f32 %v606_v18, %v245_v60  ;;  %v647_v45 = vpop.f32.mrb[12].mxu1  ;;  %v608_v0 = vpop.f32.mrb[13].mxu0 }
 0x178   :  { %v656_v44 = vadd.f32 %v647_v45, %v346_v22  ;;  %v655_v43 = vadd.f32 %v608_v0, %v247_v4  ;;  %v649_v51 = vpop.f32.mrb[13].mxu1  ;;  %v610_v26 = vpop.f32.mrb[14].mxu0 }
 0x179   :  { %v1704_v31 = vmul.f32 -1.442695, %v654_v50  ;;  %v657_v52 = vadd.f32 %v649_v51, %v348_v38  ;;  %v611_v54 = vpop.f32.mrb[15].mxu0  ;;  %v651_v53 = vpop.f32.mrb[14].mxu1  ;;  %v2971_v38 = vmov 0  }
 0x17a   :  { %v1705_v57 = vmul.f32 -1.442695, %v655_v43  ;;  %v652_v5 = vpop.f32.mrb[15].mxu1  ;;  %v1706_v46 = vmul.f32 -1.442695, %v656_v44 }
 0x17b   :  { %1928 = vpow2.f32 %v1704_v31 }
 0x17c   :  { %1930 = vpow2.f32 %v1705_v57 }
 0x17d   :  { %1932 = vpow2.f32 %v1706_v46 }
 0x17e   :  { %1934 = vtanh.f32 %v657_v52 }
 0x185   :  { %v1929_v48 = vpop.eup %1928 }
 0x186   :  { %v667_v47 = vadd.f32 1.0, %v1929_v48  ;;  %v1931_v49 = vpop.eup %1930 }
 0x187   :  { %v668_v55 = vadd.f32 1.0, %v1931_v49  ;;  %v1933_v0 = vpop.eup %1932 }
 0x188   :  { %1936 = vrcp.f32 %v667_v47  ;;  %v1935_v56 = vpop.eup %1934  ;;  %v669_v50 = vadd.f32 1.0, %v1933_v0 }
 0x189   :  { %1938 = vrcp.f32 %v668_v55 }
 0x18a   :  { %1940 = vrcp.f32 %v669_v50 }
 0x192   :  { %v1937_v58 = vpop.eup %1936 }
 0x193   :  { %v678_v61 = vmul.f32 %v1937_v58, %v1935_v56  ;;  %v1939_v26 = vpop.eup %1938 }
 0x194   :  { %v677_v54 = vmul.f32 0.0, %v1939_v26  ;;  %v1941_v5 = vpop.eup %1940 }
 0x196   :  { %v2681_v60 = vadd.f32 %v678_v61, %v677_v54 }
 0x198   :  { %1942 = vtanh.f32 %v2681_v60 }
 0x1a2   :  { %v1943_v31 = vpop.eup %1942 }
 0x1a3   :  { %v681_v44 = vmul.f32 %v1943_v31, %v1941_v5 }
 0x1a5   :  { %v682_v22 = vpack.c.bf16 %v681_v44, %v681_v44 }
 0x1a7   :  { %716 = vmatmul.mubr.bf16.vlgmr.msra.gmra.mrb[16].mxu0 %v682_v22  ;;  %757 = vmatmul.mubr.bf16.vlgmr.msra.gmra.mrb[16].mxu1 %v682_v22 }
 0x1a8   :  { %795 = vmatpush1.bf16.msra.mxu0 %v2384_v8  ;;  %836 = vmatpush1.bf16.msra.mxu1 %v2390_v9 }
 0x1a9   :  { %796 = vmatprep.subr.bf16.mxu0 %v2398_v10  ;;  %837 = vmatprep.subr.bf16.mxu1 %v2404_v11 }
 0x1aa   :  { %826 = vmatprep.mubr.bf16.mxu0 %v2971_v38  ;;  %867 = vmatprep.mubr.bf16.mxu1 %v2971_v38 }
 0x1ac   :  { %797 = vmatpush1.bf16.msra.mxu0 %v2409_v12  ;;  %838 = vmatpush1.bf16.msra.mxu1 %v2414_v13 }
 0x1ad   :  { %798 = vmatprep.subr.bf16.mxu0 %v2421_v14  ;;  %839 = vmatprep.subr.bf16.mxu1 %v2427_v15 }
 0x1b0   :  { %799 = vmatpush1.bf16.msra.mxu0 %v2433_v16  ;;  %840 = vmatpush1.bf16.msra.mxu1 %v2438_v17 }
 0x1b1   :  { %800 = vmatprep.subr.bf16.mxu0 %v2448_v19  ;;  %841 = vmatprep.subr.bf16.mxu1 %v2455_v20 }
 0x1b4   :  { %801 = vmatpush1.bf16.msra.mxu0 %v2461_v21  ;;  %842 = vmatpush1.bf16.msra.mxu1 %v2471_v23 }
 0x1b5   :  { %802 = vmatprep.subr.bf16.mxu0 %v2479_v24  ;;  %843 = vmatprep.subr.bf16.mxu1 %v2486_v25 }
 0x1b8   :  { %803 = vmatpush1.bf16.msra.mxu0 %v2497_v27  ;;  %844 = vmatpush1.bf16.msra.mxu1 %v2505_v28 }
 0x1b9   :  { %804 = vmatprep.subr.bf16.mxu0 %v2510_v29  ;;  %845 = vmatprep.subr.bf16.mxu1 %v2517_v30 }
 0x1bc   :  { %805 = vmatpush1.bf16.msra.mxu0 %v2528_v32  ;;  %846 = vmatpush1.bf16.msra.mxu1 %v2533_v33 }
 0x1bd   :  { %806 = vmatprep.subr.bf16.mxu0 %v2539_v34  ;;  %847 = vmatprep.subr.bf16.mxu1 %v2546_v35 }
 0x1c0   :  { %807 = vmatpush1.bf16.msra.mxu0 %v2553_v36  ;;  %848 = vmatpush1.bf16.msra.mxu1 %v2559_v37 }
 0x1c1   :  { %808 = vmatprep.subr.bf16.mxu0 %v2568_v39  ;;  %849 = vmatprep.subr.bf16.mxu1 %v2575_v40 }
 0x1c4   :  { %809 = vmatpush1.bf16.msra.mxu0 %v2584_v41  ;;  %850 = vmatpush1.bf16.msra.mxu1 %v2590_v42 }
 0x1c5   :  { %905 = vmatprep.subr.bf16.mxu0 %v2372_v6  ;;  %946 = vmatprep.subr.bf16.mxu1 %v2378_v7 }
 0x27a   :  { %v717_v51 = vpop.f32.mrb[16].mxu0  ;;  %v758_v57 = vpop.f32.mrb[16].mxu1 }
 0x27b   :  { %v765_v62 = vadd.f32 %v717_v51, %v2641_v59  ;;  %v767_v4 = vadd.f32 %v758_v57, %v2645_v1  ;;  %v719_v18 = vpop.f32.mrb[17].mxu0  ;;  %v760_v45 = vpop.f32.mrb[17].mxu1 }
 0x27c   :  { %v766_v43 = vadd.f32 %v719_v18, %v2643_v63  ;;  %v768_v52 = vadd.f32 %v760_v45, %v2647_v3  ;;  %v721_v53 = vpop.f32.mrb[18].mxu0  ;;  %v762_v46 = vpop.f32.mrb[18].mxu1  ;;  %v2973_v45 = vld [vmem:[#allocation19_spill] sm:$0xff] }
 0x27d   :  { %v1707_v48 = vmul.f32 -1.442695, %v765_v62  ;;  %v722_v47 = vpop.f32.mrb[19].mxu0  ;;  %v763_v49 = vpop.f32.mrb[19].mxu1  ;;  %v1709_v0 = vmul.f32 -1.442695, %v767_v4 }
 0x27e   :  { %v1708_v55 = vmul.f32 -1.442695, %v766_v43  ;;  %v2972_v4 = vld [vmem:[#allocation17_spill] sm:$0xff]  ;;  %v2974_v46 = vld [vmem:[#allocation18_spill] sm:$0xff]  ;;  %v2975_v47 = vld [vmem:[#allocation20_spill] sm:$0xff] }
 0x27f   :  { %1944 = vpow2.f32 %v1707_v48 }
 0x280   :  { %1946 = vpow2.f32 %v1708_v55 }
 0x281   :  { %1948 = vtanh.f32 %v768_v52 }
 0x282   :  { %1950 = vpow2.f32 %v1709_v0 }
 0x289   :  { %v1945_v56 = vpop.eup %1944 }
 0x28a   :  { %v778_v58 = vadd.f32 1.0, %v1945_v56  ;;  %v1947_v59 = vpop.eup %1946 }
 0x28b   :  { %v779_v1 = vadd.f32 1.0, %v1947_v59  ;;  %v1949_v63 = vpop.eup %1948 }
 0x28c   :  { %1952 = vrcp.f32 %v778_v58  ;;  %v1951_v61 = vpop.eup %1950 }
 0x28d   :  { %1954 = vrcp.f32 %v779_v1  ;;  %v780_v54 = vadd.f32 1.0, %v1951_v61 }
 0x28f   :  { %1956 = vrcp.f32 %v780_v54 }
 0x296   :  { %v1953_v3 = vpop.eup %1952 }
 0x297   :  { %v789_v26 = vmul.f32 %v1953_v3, %v1949_v63  ;;  %v1955_v50 = vpop.eup %1954 }
 0x298   :  { %v788_v5 = vmul.f32 %v1955_v50, %v2681_v60 }
 0x299   :  { %v1957_v44 = vpop.eup %1956 }
 0x29a   :  { %v2723_v31 = vadd.f32 %v789_v26, %v788_v5 }
 0x29c   :  { %1958 = vtanh.f32 %v2723_v31 }
 0x2a6   :  { %v1959_v22 = vpop.eup %1958 }
 0x2a7   :  { %v792_v51 = vmul.f32 %v1959_v22, %v1957_v44 }
 0x2a9   :  { %v793_v57 = vpack.c.bf16 %v792_v51, %v792_v51 }
 0x2ab   :  { %827 = vmatmul.mubr.bf16.vlgmr.msra.gmra.mrb[20].mxu0 %v793_v57  ;;  %868 = vmatmul.mubr.bf16.vlgmr.msra.gmra.mrb[20].mxu1 %v793_v57 }
 0x2ac   :  { %906 = vmatpush1.bf16.msra.mxu0 %v2384_v8  ;;  %947 = vmatpush1.bf16.msra.mxu1 %v2390_v9 }
 0x2ad   :  { %907 = vmatprep.subr.bf16.mxu0 %v2398_v10  ;;  %948 = vmatprep.subr.bf16.mxu1 %v2404_v11 }
 0x2ae   :  { %937 = vmatprep.mubr.bf16.mxu0 %v2971_v38  ;;  %978 = vmatprep.mubr.bf16.mxu1 %v2971_v38 }
 0x2b0   :  { %908 = vmatpush1.bf16.msra.mxu0 %v2409_v12  ;;  %949 = vmatpush1.bf16.msra.mxu1 %v2414_v13 }
 0x2b1   :  { %909 = vmatprep.subr.bf16.mxu0 %v2421_v14  ;;  %950 = vmatprep.subr.bf16.mxu1 %v2427_v15 }
 0x2b4   :  { %910 = vmatpush1.bf16.msra.mxu0 %v2433_v16  ;;  %951 = vmatpush1.bf16.msra.mxu1 %v2438_v17 }
 0x2b5   :  { %911 = vmatprep.subr.bf16.mxu0 %v2448_v19  ;;  %952 = vmatprep.subr.bf16.mxu1 %v2455_v20 }
 0x2b8   :  { %912 = vmatpush1.bf16.msra.mxu0 %v2461_v21  ;;  %953 = vmatpush1.bf16.msra.mxu1 %v2471_v23 }
 0x2b9   :  { %913 = vmatprep.subr.bf16.mxu0 %v2479_v24  ;;  %954 = vmatprep.subr.bf16.mxu1 %v2486_v25 }
 0x2bc   :  { %914 = vmatpush1.bf16.msra.mxu0 %v2497_v27  ;;  %955 = vmatpush1.bf16.msra.mxu1 %v2505_v28 }
 0x2bd   :  { %915 = vmatprep.subr.bf16.mxu0 %v2510_v29  ;;  %956 = vmatprep.subr.bf16.mxu1 %v2517_v30 }
 0x2c0   :  { %916 = vmatpush1.bf16.msra.mxu0 %v2528_v32  ;;  %957 = vmatpush1.bf16.msra.mxu1 %v2533_v33 }
 0x2c1   :  { %917 = vmatprep.subr.bf16.mxu0 %v2539_v34  ;;  %958 = vmatprep.subr.bf16.mxu1 %v2546_v35 }
 0x2c4   :  { %918 = vmatpush1.bf16.msra.mxu0 %v2553_v36  ;;  %959 = vmatpush1.bf16.msra.mxu1 %v2559_v37 }
 0x2c5   :  { %919 = vmatprep.subr.bf16.mxu0 %v2568_v39  ;;  %960 = vmatprep.subr.bf16.mxu1 %v2575_v40 }
 0x2c8   :  { %920 = vmatpush1.bf16.msra.mxu0 %v2584_v41  ;;  %961 = vmatpush1.bf16.msra.mxu1 %v2590_v42 }
 0x2c9   :  { %1016 = vmatprep.subr.bf16.mxu0 %v2372_v6  ;;  %1057 = vmatprep.subr.bf16.mxu1 %v2378_v7 }
 0x37e   :  { %v828_v60 = vpop.f32.mrb[20].mxu0  ;;  %v869_v62 = vpop.f32.mrb[20].mxu1 }
 0x37f   :  { %v876_v18 = vadd.f32 %v828_v60, %v2972_v4  ;;  %v878_v43 = vadd.f32 %v869_v62, %v2973_v45  ;;  %v830_v52 = vpop.f32.mrb[21].mxu0  ;;  %v871_v53 = vpop.f32.mrb[21].mxu1 }
 0x380   :  { %v877_v48 = vadd.f32 %v830_v52, %v2974_v46  ;;  %v879_v49 = vadd.f32 %v871_v53, %v2975_v47  ;;  %v832_v55 = vpop.f32.mrb[22].mxu0  ;;  %v873_v0 = vpop.f32.mrb[22].mxu1 }
 0x381   :  { %v1710_v56 = vmul.f32 -1.442695, %v876_v18  ;;  %v833_v58 = vpop.f32.mrb[23].mxu0  ;;  %v874_v59 = vpop.f32.mrb[23].mxu1  ;;  %v1712_v63 = vmul.f32 -1.442695, %v878_v43 }
 0x382   :  { %v1711_v1 = vmul.f32 -1.442695, %v877_v48 }
 0x383   :  { %1960 = vpow2.f32 %v1710_v56 }
 0x384   :  { %1962 = vpow2.f32 %v1711_v1 }
 0x385   :  { %1964 = vtanh.f32 %v879_v49 }
 0x386   :  { %1966 = vpow2.f32 %v1712_v63 }
 0x38d   :  { %v1961_v61 = vpop.eup %1960 }
 0x38e   :  { %v889_v3 = vadd.f32 1.0, %v1961_v61  ;;  %v1963_v26 = vpop.eup %1962 }
 0x38f   :  { %v890_v50 = vadd.f32 1.0, %v1963_v26  ;;  %v1965_v54 = vpop.eup %1964 }
 0x390   :  { %1968 = vrcp.f32 %v889_v3  ;;  %v1967_v5 = vpop.eup %1966 }
 0x391   :  { %1970 = vrcp.f32 %v890_v50  ;;  %v891_v57 = vadd.f32 1.0, %v1967_v5 }
 0x393   :  { %1972 = vrcp.f32 %v891_v57  ;;  %v2024_v57 = vld [vmem:[%s2942_s3] ss:$16 sps:$4 sm:$0xff]  }
 0x39a   :  { %v1969_v44 = vpop.eup %1968 }
 0x39b   :  { %v900_v22 = vmul.f32 %v1969_v44, %v1965_v54  ;;  %v1971_v51 = vpop.eup %1970 }
 0x39c   :  { %v899_v60 = vmul.f32 %v1971_v51, %v2723_v31  ;;  %v2979_v31 = vld [vmem:[#allocation24_spill] sm:$0xff] }
 0x39d   :  { %v1973_v4 = vpop.eup %1972 }
 0x39e   :  { %v2765_v62 = vadd.f32 %v900_v22, %v899_v60  ;;  %v2025_v60 = vld [vmem:[%s2942_s3 + $0x8] ss:$16 sps:$4 sm:$0xff]  }
 0x3a0   :  { %1974 = vtanh.f32 %v2765_v62 }
 0x3aa   :  { %v1975_v18 = vpop.eup %1974 }
 0x3ab   :  { %v903_v45 = vmul.f32 %v1975_v18, %v1973_v4  ;;  %v2027_v4 = vld [vmem:[%s2942_s3 + $0x2c] ss:$16 sps:$4 sm:$0xff]   ;;  %v2028_v18 = vld [vmem:[%s2942_s3 + $0x20] ss:$16 sps:$4 sm:$0xff]  }
 0x3ad   :  { %v904_v43 = vpack.c.bf16 %v903_v45, %v903_v45  ;;  %v2029_v45 = vld [vmem:[%s2942_s3 + $0x28] ss:$16 sps:$4 sm:$0xff]  }
 0x3af   :  { %938 = vmatmul.mubr.bf16.vlgmr.msra.gmra.mrb[24].mxu0 %v904_v43  ;;  %979 = vmatmul.mubr.bf16.vlgmr.msra.gmra.mrb[24].mxu1 %v904_v43  ;;  %v2030_v43 = vld [vmem:[%s2942_s3 + $0x44] ss:$16 sps:$4 sm:$0xff]  }
 0x3b0   :  { %1017 = vmatpush1.bf16.msra.mxu0 %v2384_v8  ;;  %1058 = vmatpush1.bf16.msra.mxu1 %v2390_v9 }
 0x3b1   :  { %1018 = vmatprep.subr.bf16.mxu0 %v2398_v10  ;;  %1059 = vmatprep.subr.bf16.mxu1 %v2404_v11  ;;  %v2976_v10 = vld [vmem:[#allocation21_spill] sm:$0xff] }
 0x3b2   :  { %1048 = vmatprep.mubr.bf16.mxu0 %v2971_v38  ;;  %1089 = vmatprep.mubr.bf16.mxu1 %v2971_v38 }
 0x3b4   :  { %1019 = vmatpush1.bf16.msra.mxu0 %v2409_v12  ;;  %1060 = vmatpush1.bf16.msra.mxu1 %v2414_v13  ;;  %v2977_v12 = vld [vmem:[#allocation23_spill] sm:$0xff] }
 0x3b5   :  { %1020 = vmatprep.subr.bf16.mxu0 %v2421_v14  ;;  %1061 = vmatprep.subr.bf16.mxu1 %v2427_v15 }
 0x3b8   :  { %1021 = vmatpush1.bf16.msra.mxu0 %v2433_v16  ;;  %1062 = vmatpush1.bf16.msra.mxu1 %v2438_v17  ;;  %v2978_v16 = vld [vmem:[#allocation22_spill] sm:$0xff] }
 0x3b9   :  { %1022 = vmatprep.subr.bf16.mxu0 %v2448_v19  ;;  %1063 = vmatprep.subr.bf16.mxu1 %v2455_v20 }
 0x3bc   :  { %1023 = vmatpush1.bf16.msra.mxu0 %v2461_v21  ;;  %1064 = vmatpush1.bf16.msra.mxu1 %v2471_v23 }
 0x3bd   :  { %1024 = vmatprep.subr.bf16.mxu0 %v2479_v24  ;;  %1065 = vmatprep.subr.bf16.mxu1 %v2486_v25 }
 0x3c0   :  { %1025 = vmatpush1.bf16.msra.mxu0 %v2497_v27  ;;  %1066 = vmatpush1.bf16.msra.mxu1 %v2505_v28 }
 0x3c1   :  { %1026 = vmatprep.subr.bf16.mxu0 %v2510_v29  ;;  %1067 = vmatprep.subr.bf16.mxu1 %v2517_v30 }
 0x3c4   :  { %1027 = vmatpush1.bf16.msra.mxu0 %v2528_v32  ;;  %1068 = vmatpush1.bf16.msra.mxu1 %v2533_v33 }
 0x3c5   :  { %1028 = vmatprep.subr.bf16.mxu0 %v2539_v34  ;;  %1069 = vmatprep.subr.bf16.mxu1 %v2546_v35 }
 0x3c8   :  { %1029 = vmatpush1.bf16.msra.mxu0 %v2553_v36  ;;  %1070 = vmatpush1.bf16.msra.mxu1 %v2559_v37 }
 0x3c9   :  { %1030 = vmatprep.subr.bf16.mxu0 %v2568_v39  ;;  %1071 = vmatprep.subr.bf16.mxu1 %v2575_v40 }
 0x3cc   :  { %1031 = vmatpush1.bf16.msra.mxu0 %v2584_v41  ;;  %1072 = vmatpush1.bf16.msra.mxu1 %v2590_v42 }
 0x3cd   :  { %1127 = vmatprep.subr.bf16.mxu0 %v2372_v6  ;;  %1168 = vmatprep.subr.bf16.mxu1 %v2378_v7 }
 0x482   :  { %v939_v8 = vpop.f32.mrb[24].mxu0  ;;  %v980_v9 = vpop.f32.mrb[24].mxu1 }
 0x483   :  { %v987_v11 = vadd.f32 %v939_v8, %v2976_v10  ;;  %v989_v13 = vadd.f32 %v980_v9, %v2977_v12  ;;  %v941_v14 = vpop.f32.mrb[25].mxu0  ;;  %v982_v15 = vpop.f32.mrb[25].mxu1  ;;  %v2031_v8 = vld [vmem:[%s2942_s3 + $0x4c] ss:$16 sps:$4 sm:$0xff]   ;;  %v2033_v9 = vld [vmem:[%s2942_s3 + $0x48] ss:$16 sps:$4 sm:$0xff]  }
 0x484   :  { %v988_v17 = vadd.f32 %v941_v14, %v2978_v16  ;;  %v990_v52 = vadd.f32 %v982_v15, %v2979_v31  ;;  %v943_v53 = vpop.f32.mrb[26].mxu0  ;;  %v984_v46 = vpop.f32.mrb[26].mxu1 }
 0x485   :  { %v1713_v48 = vmul.f32 -1.442695, %v987_v11  ;;  %v944_v47 = vpop.f32.mrb[27].mxu0  ;;  %v985_v49 = vpop.f32.mrb[27].mxu1  ;;  %v1715_v7 = vmul.f32 -1.442695, %v989_v13 }
 0x486   :  { %v1714_v6 = vmul.f32 -1.442695, %v988_v17 }
 0x487   :  { %1976 = vpow2.f32 %v1713_v48 }
 0x488   :  { %1978 = vpow2.f32 %v1714_v6 }
 0x489   :  { %1980 = vtanh.f32 %v990_v52 }
 0x48a   :  { %1982 = vpow2.f32 %v1715_v7  ;;  %v1904_v7 = vld [vmem:[%s2945_s6] sm:$0xff]  }
 0x491   :  { %v1977_v55 = vpop.eup %1976 }
 0x492   :  { %v1000_v0 = vadd.f32 1.0, %v1977_v55  ;;  %v1979_v56 = vpop.eup %1978  ;;  %v1905_v55 = vld [vmem:[%s2945_s6 + $0x8] sm:$0xff]  }
 0x493   :  { %v1001_v58 = vadd.f32 1.0, %v1979_v56  ;;  %v1981_v59 = vpop.eup %1980  ;;  %v1907_v56 = vld [vmem:[%s2945_s6 + $0x18] sm:$0xff]  }
 0x494   :  { %1984 = vrcp.f32 %v1000_v0  ;;  %v1983_v1 = vpop.eup %1982  ;;  %v1906_v0 = vld [vmem:[%s2945_s6 + $0x10] sm:$0xff]  }
 0x495   :  { %1986 = vrcp.f32 %v1001_v58  ;;  %v1002_v26 = vadd.f32 1.0, %v1983_v1  ;;  %v1908_v58 = vld [vmem:[%s2945_s6 + $0x20] sm:$0xff]  }
 0x496   :  { %v1238_v1 = vld [vmem:[#allocation4] sm:$0xff] }
 0x497   :  { %1988 = vrcp.f32 %v1002_v26  ;;  %v1912_v26 = vld [vmem:[#allocation7] sm:$0xff]  }
 0x49e   :  { %v1985_v63 = vpop.eup %1984 }
 0x49f   :  { %v1011_v61 = vmul.f32 %v1985_v63, %v1981_v59  ;;  %v1987_v3 = vpop.eup %1986  ;;  %v1909_v59 = vld [vmem:[%s2945_s6 + $0x28] sm:$0xff]   ;;  %v1237_v63 = vld [vmem:[%s2940_s1] sm:$0xff] }
 0x4a0   :  { %v1010_v50 = vmul.f32 %v1987_v3, %v2765_v62  ;;  %v2026_v62 = vld [vmem:[%s2942_s3 + $0x24] ss:$16 sps:$4 sm:$0xff]   ;;  %v1911_v3 = vld [vmem:[%s2945_s6 + $0x38] sm:$0xff]  }
 0x4a1   :  { %v1989_v5 = vpop.eup %1988 }
 0x4a2   :  { %v2807_v54 = vadd.f32 %v1011_v61, %v1010_v50  ;;  %v1910_v61 = vld [vmem:[%s2945_s6 + $0x30] sm:$0xff]  }
 0x4a3   :  { %v1913_v50 = vld [vmem:[#allocation7 + $0x8] sm:$0xff]  }
 0x4a4   :  { %1990 = vtanh.f32 %v2807_v54 }
 0x4ae   :  { %v1991_v44 = vpop.eup %1990 }
 0x4af   :  { %v1014_v22 = vmul.f32 %v1991_v44, %v1989_v5  ;;  %v1915_v5 = vld [vmem:[#allocation7 + $0x18] sm:$0xff]   ;;  %v1916_v44 = vld [vmem:[#allocation7 + $0x20] sm:$0xff]  }
 0x4b1   :  { %v1015_v51 = vpack.c.bf16 %v1014_v22, %v1014_v22  ;;  %v1917_v22 = vld [vmem:[#allocation7 + $0x28] sm:$0xff]  }
 0x4b3   :  { %1049 = vmatmul.mubr.bf16.vlgmr.msra.gmra.mrb[28].mxu0 %v1015_v51  ;;  %1090 = vmatmul.mubr.bf16.vlgmr.msra.gmra.mrb[28].mxu1 %v1015_v51 }
 0x4b4   :  { %1128 = vmatpush1.bf16.msra.mxu0 %v2024_v57  ;;  %1169 = vmatpush1.bf16.msra.mxu1 %v2025_v60  ;;  %v2985_v60 = vld [vmem:[#allocation29_spill] sm:$0xff] }
 0x4b5   :  { %1129 = vmatprep.subr.bf16.mxu0 %v2026_v62  ;;  %1170 = vmatprep.subr.bf16.mxu1 %v2027_v4  ;;  %v2986_v4 = vld [vmem:[#allocation31_spill] sm:$0xff] }
 0x4b6   :  { %1159 = vmatprep.mubr.bf16.mxu0 %v2971_v38  ;;  %1200 = vmatprep.mubr.bf16.mxu1 %v2971_v38  ;;  %v2032_v38 = vld [vmem:[%s2942_s3 + $0x40] ss:$16 sps:$4 sm:$0xff]  }
 0x4b8   :  { %1130 = vmatpush1.bf16.msra.mxu0 %v2028_v18  ;;  %1171 = vmatpush1.bf16.msra.mxu1 %v2029_v45 }
 0x4b9   :  { %1131 = vmatprep.subr.bf16.mxu0 %v2030_v43  ;;  %1172 = vmatprep.subr.bf16.mxu1 %v2031_v8  ;;  %v2987_v8 = vld [vmem:[#allocation30_spill] sm:$0xff] }
 0x4bc   :  { %1132 = vmatpush1.bf16.msra.mxu0 %v2032_v38  ;;  %1173 = vmatpush1.bf16.msra.mxu1 %v2033_v9 }
 0x4bd   :  { %1133 = vmatprep.subr.bf16.mxu0 %v2448_v19  ;;  %1174 = vmatprep.subr.bf16.mxu1 %v2455_v20  ;;  %v2980_v19 = vmov 0.0  }
 0x4c0   :  { %1134 = vmatpush1.bf16.msra.mxu0 %v2461_v21  ;;  %1175 = vmatpush1.bf16.msra.mxu1 %v2471_v23  ;;  %v2981_v23 = vld [vmem:[#allocation25_spill] sm:$0xff] }
 0x4c1   :  { %1135 = vmatprep.subr.bf16.mxu0 %v2479_v24  ;;  %1176 = vmatprep.subr.bf16.mxu1 %v2486_v25  ;;  %v2982_v25 = vld [vmem:[#allocation27_spill] sm:$0xff] }
 0x4c4   :  { %1136 = vmatpush1.bf16.msra.mxu0 %v2497_v27  ;;  %1177 = vmatpush1.bf16.msra.mxu1 %v2505_v28 }
 0x4c5   :  { %1137 = vmatprep.subr.bf16.mxu0 %v2510_v29  ;;  %1178 = vmatprep.subr.bf16.mxu1 %v2517_v30  ;;  %v2983_v30 = vld [vmem:[#allocation26_spill] sm:$0xff] }
 0x4c8   :  { %1138 = vmatpush1.bf16.msra.mxu0 %v2528_v32  ;;  %1179 = vmatpush1.bf16.msra.mxu1 %v2533_v33  ;;  %v2984_v33 = vld [vmem:[#allocation28_spill] sm:$0xff] }
 0x4c9   :  { %1139 = vmatprep.subr.bf16.mxu0 %v2539_v34  ;;  %1180 = vmatprep.subr.bf16.mxu1 %v2546_v35 }
 0x4cc   :  { %1140 = vmatpush1.bf16.msra.mxu0 %v2553_v36  ;;  %1181 = vmatpush1.bf16.msra.mxu1 %v2559_v37 }
 0x4cd   :  { %1141 = vmatprep.subr.bf16.mxu0 %v2568_v39  ;;  %1182 = vmatprep.subr.bf16.mxu1 %v2575_v40 }
 0x4d0   :  { %1142 = vmatpush1.bf16.msra.mxu0 %v2584_v41  ;;  %1183 = vmatpush1.bf16.msra.mxu1 %v2590_v42 }
 0x4d1   :  { %1779 = vmatprep.subr.bf16.mxu0 %v2980_v19  ;;  %1799 = vmatprep.subr.mxu1 %v2980_v19 }
 0x586   :  { %v1050_v20 = vpop.f32.mrb[28].mxu0  ;;  %v1091_v21 = vpop.f32.mrb[28].mxu1 }
 0x587   :  { %v1098_v24 = vadd.f32 %v1050_v20, %v2981_v23  ;;  %v1100_v27 = vadd.f32 %v1091_v21, %v2982_v25  ;;  %v1052_v28 = vpop.f32.mrb[29].mxu0  ;;  %v1093_v29 = vpop.f32.mrb[29].mxu1 }
 0x588   :  { %v1099_v32 = vadd.f32 %v1052_v28, %v2983_v30  ;;  %v1101_v34 = vadd.f32 %v1093_v29, %v2984_v33  ;;  %v1054_v35 = vpop.f32.mrb[30].mxu0  ;;  %v1095_v36 = vpop.f32.mrb[30].mxu1 }
 0x589   :  { %v1716_v37 = vmul.f32 -1.442695, %v1098_v24  ;;  %v1055_v39 = vpop.f32.mrb[31].mxu0  ;;  %v1096_v40 = vpop.f32.mrb[31].mxu1  ;;  %v1718_v42 = vmul.f32 -1.442695, %v1100_v27 }
 0x58a   :  { %v1717_v41 = vmul.f32 -1.442695, %v1099_v32 }
 0x58b   :  { %1992 = vpow2.f32 %v1716_v37 }
 0x58c   :  { %1994 = vpow2.f32 %v1717_v41 }
 0x58d   :  { %1996 = vtanh.f32 %v1101_v34 }
 0x58e   :  { %1998 = vpow2.f32 %v1718_v42 }
 0x595   :  { %v1993_v10 = vpop.eup %1992 }
 0x596   :  { %v1111_v11 = vadd.f32 1.0, %v1993_v10  ;;  %v1995_v12 = vpop.eup %1994 }
 0x597   :  { %v1112_v13 = vadd.f32 1.0, %v1995_v12  ;;  %v1997_v14 = vpop.eup %1996 }
 0x598   :  { %2000 = vrcp.f32 %v1111_v11  ;;  %v1999_v15 = vpop.eup %1998 }
 0x599   :  { %2002 = vrcp.f32 %v1112_v13  ;;  %v1113_v52 = vadd.f32 1.0, %v1999_v15  ;;  %v1918_v15 = vld [vmem:[#allocation7 + $0x30] sm:$0xff]  }
 0x59b   :  { %2004 = vrcp.f32 %v1113_v52  ;;  %v1922_v52 = vld [vmem:[#allocation10 + $0x10] sm:$0xff]  }
 0x5a2   :  { %v2001_v16 = vpop.eup %2000 }
 0x5a3   :  { %v1122_v17 = vmul.f32 %v2001_v16, %v1997_v14  ;;  %v2003_v31 = vpop.eup %2002  ;;  %v1919_v16 = vld [vmem:[#allocation7 + $0x38] sm:$0xff]  }
 0x5a4   :  { %v1121_v53 = vmul.f32 %v2003_v31, %v2807_v54  ;;  %v1914_v54 = vld [vmem:[#allocation7 + $0x10] sm:$0xff]  }
 0x5a5   :  { %v2005_v48 = vpop.eup %2004  ;;  %v1921_v31 = vld [vmem:[#allocation10 + $0x8] sm:$0xff]  }
 0x5a6   :  { %v2869_v46 = vadd.f32 %v1122_v17, %v1121_v53  ;;  %v1920_v17 = vld [vmem:[#allocation10] sm:$0xff]   ;;  %v1923_v53 = vld [vmem:[#allocation10 + $0x18] sm:$0xff]  }
 0x5a8   :  { %2006 = vtanh.f32 %v2869_v46 }
 0x5b2   :  { %v2007_v47 = vpop.eup %2006 }
 0x5b3   :  { %v1125_v49 = vmul.f32 %v2007_v47, %v2005_v48  ;;  %v1925_v48 = vld [vmem:[#allocation10 + $0x28] sm:$0xff]  }
 0x5b5   :  { %v1126_v6 = vpack.c.bf16 %v1125_v49, %v1125_v49  ;;  %v1731_v49 = vld [vmem:[#allocation6] ss:$0 sm:$0xff] }
 0x5b7   :  { %1160 = vmatmul.mubr.bf16.vlgmr.msra.gmra.mrb[32].mxu0 %v1126_v6  ;;  %1201 = vmatmul.mubr.bf16.vlgmr.msra.gmra.mrb[32].mxu1 %v1126_v6 }
 0x5b8   :  { %1780 = vmatpush3.bf16.msra.mxu0 %v1904_v7  ;;  %1800 = vmatpush3.msra.mxu1 %v1238_v1  ;;  %v1926_v1 = vld [vmem:[#allocation10 + $0x30] sm:$0xff]  }
 0x5b9   :  { %1781 = vmatprep.subr.bf16.mxu0 %v2980_v19  ;;  %1801 = vmatprep.mubr.msk.f32.mxu1 %vm2207_vm1, %v2980_v19 }
 0x5ba   :  { %1795 = vmatprep.mubr.msk.bf16.mxu0 %vm2207_vm1, %v2980_v19  ;;  %1804 = vmatprep.subr.bf16.mxu1 %v2980_v19 }
 0x5bc   :  { %1782 = vmatpush3.bf16.msra.mxu0 %v1905_v55 }
 0x5bd   :  { %1783 = vmatprep.subr.bf16.mxu0 %v2980_v19 }
 0x5bf   :  { %1802 = vmatmul.mubr.msk.f32.vlgmr.msra.gmra.mrb[36].mxu1 %vm159_vm0, %v1237_v63  ;;  %v1927_v63 = vld [vmem:[#allocation10 + $0x38] sm:$0xff]  }
 0x5c0   :  { %1784 = vmatpush3.bf16.msra.mxu0 %v1906_v0  ;;  %1820 = vmatprep.mubr.msk.bf16.mxu1 %vm2207_vm1, %v2980_v19 }
 0x5c1   :  { %1785 = vmatprep.subr.bf16.mxu0 %v2980_v19  ;;  %1805 = vmatpush3.bf16.msra.mxu1 %v1912_v26 }
 0x5c2   :  { %1806 = vmatprep.subr.bf16.mxu1 %v2980_v19 }
 0x5c4   :  { %1786 = vmatpush3.bf16.msra.mxu0 %v1907_v56 }
 0x5c5   :  { %1787 = vmatprep.subr.bf16.mxu0 %v2980_v19  ;;  %1807 = vmatpush3.bf16.msra.mxu1 %v1913_v50 }
 0x5c6   :  { %1808 = vmatprep.subr.bf16.mxu1 %v2980_v19 }
 0x5c8   :  { %1788 = vmatpush3.bf16.msra.mxu0 %v1908_v58 }
 0x5c9   :  { %1789 = vmatprep.subr.bf16.mxu0 %v2980_v19  ;;  %1809 = vmatpush3.bf16.msra.mxu1 %v1914_v54 }
 0x5ca   :  { %1810 = vmatprep.subr.bf16.mxu1 %v2980_v19 }
 0x5cc   :  { %1790 = vmatpush3.bf16.msra.mxu0 %v1909_v59 }
 0x5cd   :  { %1791 = vmatprep.subr.bf16.mxu0 %v2980_v19  ;;  %1811 = vmatpush3.bf16.msra.mxu1 %v1915_v5 }
 0x5ce   :  { %1812 = vmatprep.subr.bf16.mxu1 %v2980_v19 }
 0x5d0   :  { %1792 = vmatpush3.bf16.msra.mxu0 %v1910_v61  ;;  %v1732_v61 = vld [vmem:[#allocation9] ss:$0 sm:$0xff] }
 0x5d1   :  { %1793 = vmatprep.subr.bf16.mxu0 %v2980_v19  ;;  %1813 = vmatpush3.bf16.msra.mxu1 %v1916_v44 }
 0x5d2   :  { %1814 = vmatprep.subr.bf16.mxu1 %v2980_v19 }
 0x5d4   :  { %1794 = vmatpush3.bf16.msra.mxu0 %v1911_v3 }
 0x5d5   :  { %1824 = vmatprep.subr.bf16.mxu0 %v2980_v19  ;;  %1815 = vmatpush3.bf16.msra.mxu1 %v1917_v22 }
 0x5d6   :  { %1816 = vmatprep.subr.bf16.mxu1 %v2980_v19 }
 0x5d9   :  { %1817 = vmatpush3.bf16.msra.mxu1 %v1918_v15 }
 0x5da   :  { %1818 = vmatprep.subr.bf16.mxu1 %v2980_v19 }
 0x5dd   :  { %1819 = vmatpush3.bf16.msra.mxu1 %v1919_v16 }
 0x68a   :  { %v1161_v51 = vpop.f32.mrb[32].mxu0  ;;  %v1202_v57 = vpop.f32.mrb[32].mxu1 }
 0x68b   :  { %v1209_v62 = vadd.f32 %v1161_v51, %v2985_v60  ;;  %v1211_v18 = vadd.f32 %v1202_v57, %v2986_v4  ;;  %v1163_v45 = vpop.f32.mrb[33].mxu0  ;;  %v1204_v43 = vpop.f32.mrb[33].mxu1  ;;  %v1741_v51 = vld [vmem:[#allocation12] ss:$0 sm:$0xff] }
 0x68c   :  { %v1210_v38 = vadd.f32 %v1163_v45, %v2987_v8  ;;  %v1212_v9 = vadd.f32 %v1204_v43, %v2679_v2  ;;  %v1165_v20 = vpop.f32.mrb[34].mxu0  ;;  %v1206_v21 = vpop.f32.mrb[34].mxu1 }
 0x68d   :  { %v1719_v23 = vmul.f32 -1.442695, %v1209_v62  ;;  %v1166_v24 = vpop.f32.mrb[35].mxu0  ;;  %v1207_v25 = vpop.f32.mrb[35].mxu1  ;;  %v1721_v28 = vmul.f32 -1.442695, %v1211_v18 }
 0x68e   :  { %v1720_v27 = vmul.f32 -1.442695, %v1210_v38 }
 0x68f   :  { %2008 = vpow2.f32 %v1719_v23 }
 0x690   :  { %2010 = vpow2.f32 %v1720_v27 }
 0x691   :  { %2012 = vtanh.f32 %v1212_v9 }
 0x692   :  { %2014 = vpow2.f32 %v1721_v28  ;;  %v1413_v13 = vpop.f32.mrb[36].mxu1 }
 0x693   :  { %v1803_v14 = vpop.f32.mrb[37].mxu1 }
 0x699   :  { %v2009_v29 = vpop.eup %2008 }
 0x69a   :  { %v1222_v30 = vadd.f32 1.0, %v2009_v29  ;;  %v2011_v32 = vpop.eup %2010 }
 0x69b   :  { %v1223_v33 = vadd.f32 1.0, %v2011_v32  ;;  %v2013_v34 = vpop.eup %2012 }
 0x69c   :  { %2016 = vrcp.f32 %v1222_v30  ;;  %v2015_v35 = vpop.eup %2014 }
 0x69d   :  { %2018 = vrcp.f32 %v1223_v33  ;;  %v1224_v39 = vadd.f32 1.0, %v2015_v35 }
 0x69f   :  { %2020 = vrcp.f32 %v1224_v39 }
 0x6a6   :  { %v2017_v2 = vpop.eup %2016 }
 0x6a7   :  { %v1233_v36 = vmul.f32 %v2017_v2, %v2013_v34  ;;  %v2019_v37 = vpop.eup %2018 }
 0x6a8   :  { %v1232_v40 = vmul.f32 %v2019_v37, %v2869_v46  ;;  %v1924_v46 = vld [vmem:[#allocation10 + $0x20] sm:$0xff]  }
 0x6a9   :  { %v2021_v42 = vpop.eup %2020 }
 0x6aa   :  { %v1234_v41 = vadd.f32 %v1233_v36, %v1232_v40 }
 0x6ac   :  { %2022 = vtanh.f32 %v1234_v41 }
 0x6b6   :  { %v2023_v10 = vpop.eup %2022 }
 0x6b7   :  { %v1236_v11 = vmul.f32 %v2023_v10, %v2021_v42 }
 0x6b9   :  { %v1239_v12 = vpack.c.bf16 %v1236_v11, %v1236_v11 }
 0x6bb   :  { %1796 = vmatmul.mubr.bf16.vlgmr.msra.gmra.mrb[36].mxu0 %v1239_v12 }
 0x6bc   :  { %1840 = vmatprep.mubr.msk.bf16.mxu0 %vm2207_vm1, %v2980_v19  ;;  %1825 = vmatpush3.bf16.msra.mxu0 %v1920_v17 }
 0x6bd   :  { %1826 = vmatprep.subr.bf16.mxu0 %v2980_v19 }
 0x6c0   :  { %1827 = vmatpush3.bf16.msra.mxu0 %v1921_v31 }
 0x6c1   :  { %1828 = vmatprep.subr.bf16.mxu0 %v2980_v19 }
 0x6c4   :  { %1829 = vmatpush3.bf16.msra.mxu0 %v1922_v52 }
 0x6c5   :  { %1830 = vmatprep.subr.bf16.mxu0 %v2980_v19 }
 0x6c8   :  { %1831 = vmatpush3.bf16.msra.mxu0 %v1923_v53 }
 0x6c9   :  { %1832 = vmatprep.subr.bf16.mxu0 %v2980_v19 }
 0x6cc   :  { %1833 = vmatpush3.bf16.msra.mxu0 %v1924_v46 }
 0x6cd   :  { %1834 = vmatprep.subr.bf16.mxu0 %v2980_v19 }
 0x6d0   :  { %1835 = vmatpush3.bf16.msra.mxu0 %v1925_v48 }
 0x6d1   :  { %1836 = vmatprep.subr.bf16.mxu0 %v2980_v19 }
 0x6d4   :  { %1837 = vmatpush3.bf16.msra.mxu0 %v1926_v1 }
 0x6d5   :  { %1838 = vmatprep.subr.bf16.mxu0 %v2980_v19 }
 0x6d8   :  { %1839 = vmatpush3.bf16.msra.mxu0 %v1927_v63 }
 0x78e   :  { %v1338_v47 = vpop.f32.mrb[36].mxu0 }
 0x78f   :  { %v1414_v6 = vadd.f32 %v1413_v13, %v1338_v47  ;;  %v1797_v7 = vpop.f32.mrb[37].mxu0 }
 0x790   :  { %v1341_v55 = vpop.f32.mrb[38].mxu0 }
 0x791   :  { %v1424_v0 = vadd.f32 %v1731_v49, %v1414_v6  ;;  %v1798_v56 = vpop.f32.mrb[39].mxu0 }
 0x793   :  { %v1425_v58 = vmax.f32 %v1424_v0, 0.0 }
 0x795   :  { %v1426_v59 = vpack.c.bf16 %v1425_v58, %v1425_v58 }
 0x797   :  { %1821 = vmatmul.mubr.bf16.vlgmr.msra.gmra.mrb[40].mxu1 %v1426_v59 }
 0x86a   :  { %v1532_v3 = vpop.f32.mrb[40].mxu1 }
 0x86b   :  { %v1533_v26 = vadd.f32 %v1732_v61, %v1532_v3  ;;  %v1822_v50 = vpop.f32.mrb[41].mxu1 }
 0x86c   :  { %v1535_v54 = vpop.f32.mrb[42].mxu1 }
 0x86d   :  { %v1538_v5 = vmax.f32 %v1533_v26, 0.0  ;;  %v1823_v44 = vpop.f32.mrb[43].mxu1 }
 0x86f   :  { %v1539_v22 = vpack.c.bf16 %v1538_v5, %v1538_v5 }
 0x871   :  { %1841 = vmatmul.mubr.bf16.vlgmr.msra.gmra.mrb[40].mxu0 %v1539_v22 }
 0x944   :  { %v1645_v57 = vpop.f32.mrb[40].mxu0 }
 0x945   :  { %v1646_v60 = vadd.f32 %v1741_v51, %v1645_v57  ;;  %v1842_v62 = vpop.f32.mrb[41].mxu0 }
 0x946   :  { %v1648_v4 = vpop.f32.mrb[42].mxu0 }
 0x947   :  { %1651 = vst [vmem:[%s2951_s12] sm:$0xff] %v1646_v60  ;;  %v1843_v19 = vpop.f32.mrb[43].mxu0 }
 0x948   :  { %1656 = vsyncpa [#allocation3], 1 }
 0x949   :  { %1657 = vsyncpa [#allocation5], 1 }
 0x94a   :  { %1658 = vsyncpa [#allocation8], 1 }
 0x94b   :  { %1659 = vsyncpa [#allocation11], 1 }

</bundles_post_ra>
